<compile_context>
chip_gen: v7x
topology: tpu7x:2x2x1
jax: 0.10.0
libtpu: 0.0.40
codegen_flags: <defaults>
</compile_context>

<pallas_src>
import jax
import jax.numpy as jnp
import numpy as np
from jax.experimental import pallas as pl
from jax.experimental.pallas import tpu as pltpu


# --------------------------- fused per-image kernel ---------------------------

def _net_kernel(x_ref, g1_ref, t1_ref, b1_ref, g2_ref, t2_ref, b2_ref,
                w1_ref, fb1_ref, w2_ref, fb2_ref, w3_ref, fb3_ref, o_ref):
    f32 = jnp.float32

    # ---- conv1 (5x5, 3->6) + 2x2/2 max-pool + bias + tanh ------------------
    x = x_ref[...]                                                   # (32, 96) = (H, W*C)
    bands1 = jnp.dot(g1_ref[...], x, preferred_element_type=f32)     # (160, 96) row bands
    z1_even = jnp.dot(bands1[0:32, :], t1_ref[0], preferred_element_type=f32)   # (32, 84)
    z1_odd = jnp.dot(bands1[0:32, :], t1_ref[1], preferred_element_type=f32)
    for di in range(1, 5):
        blk = bands1[32 * di:32 * di + 32, :]
        z1_even = z1_even + jnp.dot(blk, t1_ref[2 * di + 0], preferred_element_type=f32)
        z1_odd = z1_odd + jnp.dot(blk, t1_ref[2 * di + 1], preferred_element_type=f32)
    # pool over the four 2x2 offsets (rows 0:16 vs 16:32 = row offset, even/odd = width offset)
    pre1 = jnp.maximum(jnp.maximum(z1_even[0:16, :], z1_even[16:32, :]),
                       jnp.maximum(z1_odd[0:16, :], z1_odd[16:32, :]))           # (16, 84)
    a1 = jnp.tanh(pre1 + b1_ref[...])                                 # rows 0..13 valid

    # ---- conv2 (5x5, 6->16) + 2x2/2 max-pool + bias + tanh -----------------
    bands2 = jnp.dot(g2_ref[...], a1, preferred_element_type=f32)     # (80, 84)
    z2_even = jnp.dot(bands2[0:16, :], t2_ref[0], preferred_element_type=f32)    # (16, 80)
    z2_odd = jnp.dot(bands2[0:16, :], t2_ref[1], preferred_element_type=f32)
    for di in range(1, 5):
        blk = bands2[16 * di:16 * di + 16, :]
        z2_even = z2_even + jnp.dot(blk, t2_ref[2 * di + 0], preferred_element_type=f32)
        z2_odd = z2_odd + jnp.dot(blk, t2_ref[2 * di + 1], preferred_element_type=f32)
    pre2 = jnp.maximum(jnp.maximum(z2_even[0:8, :], z2_even[8:16, :]),
                       jnp.maximum(z2_odd[0:8, :], z2_odd[8:16, :]))              # (8, 80)
    a2 = jnp.tanh(pre2 + b2_ref[...])                                  # rows 0..4 valid

    # ---- fc1 + tanh (the 5x5x16 flatten is folded into 5 row-block matmuls) -
    h = jnp.dot(a2[0:1, :], w1_ref[0], preferred_element_type=f32)     # (1, 120)
    for u in range(1, 5):
        h = h + jnp.dot(a2[u:u + 1, :], w1_ref[u], preferred_element_type=f32)
    h = jnp.tanh(h + fb1_ref[...])

    # ---- fc2 + tanh, fc3 + log_softmax --------------------------------------
    h = jnp.tanh(jnp.dot(h, w2_ref[...], preferred_element_type=f32) + fb2_ref[...])
    y = jnp.dot(h, w3_ref[...], preferred_element_type=f32) + fb3_ref[...]        # (1, 10)
    y = y - jnp.max(y, axis=-1, keepdims=True)
    o_ref[...] = y - jnp.log(jnp.sum(jnp.exp(y), axis=-1, keepdims=True))


# --------------------------- pallas_call wrapper ------------------------------

def net_forward(x, kp):
    """x: (B, 3, 32, 32) NCHW float32 -> (B, 10) log-probabilities."""
    B = x.shape[0]
    xh = jnp.transpose(x, (0, 2, 3, 1)).reshape(B, 32, 96)   # (H, W*C) per image
    out = pl.pallas_call(
        _net_kernel,
        out_shape=jax.ShapeDtypeStruct((B, 1, 10), jnp.float32),
        grid=(B,),
        in_specs=[
            pl.BlockSpec((None, 32, 96), lambda i: (i, 0, 0)),     # image (per grid step)
            pl.BlockSpec((160, 32), lambda i: (0, 0)),             # conv1 row-gather
            pl.BlockSpec((10, 96, 84), lambda i: (0, 0, 0)),       # conv1 Toeplitz weights
            pl.BlockSpec((1, 84), lambda i: (0, 0)),               # conv1 bias (tiled)
            pl.BlockSpec((80, 16), lambda i: (0, 0)),              # conv2 row-gather
            pl.BlockSpec((10, 84, 80), lambda i: (0, 0, 0)),       # conv2 Toeplitz weights
            pl.BlockSpec((1, 80), lambda i: (0, 0)),               # conv2 bias (tiled)
            pl.BlockSpec((5, 80, 120), lambda i: (0, 0, 0)),       # fc1 weight (re-blocked)
            pl.BlockSpec((1, 120), lambda i: (0, 0)),              # fc1 bias
            pl.BlockSpec((120, 84), lambda i: (0, 0)),             # fc2 weight
            pl.BlockSpec((1, 84), lambda i: (0, 0)),               # fc2 bias
            pl.BlockSpec((84, 10), lambda i: (0, 0)),              # fc3 weight
            pl.BlockSpec((1, 10), lambda i: (0, 0)),               # fc3 bias
        ],
        out_specs=pl.BlockSpec((None, 1, 10), lambda i: (i, 0, 0)),
        compiler_params=pltpu.CompilerParams(dimension_semantics=("parallel",)),
    )(xh, kp["g1"], kp["t1"], kp["b1r"], kp["g2"], kp["t2"], kp["b2r"],
      kp["w1v"], kp["fb1"], kp["w2t"], kp["fb2"], kp["w3t"], kp["fb3"])
    return out.reshape(B, 10)


# --------------------------- params -------------------------------------------

def init_params(key):
    ks = jax.random.split(key, 10)

    def rnd(k, shape, fan_in):
        return (jax.random.normal(k, shape, jnp.float32) / np.sqrt(fan_in)).astype(jnp.float32)

    return {
        "conv1_w": rnd(ks[0], (6, 3, 5, 5), 3 * 5 * 5),
        "conv1_b": rnd(ks[1], (6,), 3 * 5 * 5),
        "conv2_w": rnd(ks[2], (16, 6, 5, 5), 6 * 5 * 5),
        "conv2_b": rnd(ks[3], (16,), 6 * 5 * 5),
        "fc1_w": rnd(ks[4], (120, 400), 400),
        "fc1_b": rnd(ks[5], (120,), 400),
        "fc2_w": rnd(ks[6], (84, 120), 120),
        "fc2_b": rnd(ks[7], (84,), 120),
        "fc3_w": rnd(ks[8], (10, 84), 84),
        "fc3_b": rnd(ks[9], (10,), 84),
    }


def prepare_params(p):
    """One-time constant construction (numpy): row-gather matrices, block-Toeplitz conv
    weights (one per kernel-row x pool-width-offset), tiled biases, re-blocked fc1."""
    w1 = np.asarray(p["conv1_w"], np.float32)   # (6, 3, 5, 5)  OIHW
    b1 = np.asarray(p["conv1_b"], np.float32)
    w2 = np.asarray(p["conv2_w"], np.float32)   # (16, 6, 5, 5)
    b2 = np.asarray(p["conv2_b"], np.float32)
    f1w = np.asarray(p["fc1_w"], np.float32)    # (120, 400)
    f1b = np.asarray(p["fc1_b"], np.float32)
    f2w = np.asarray(p["fc2_w"], np.float32)    # (84, 120)
    f2b = np.asarray(p["fc2_b"], np.float32)
    f3w = np.asarray(p["fc3_w"], np.float32)    # (10, 84)
    f3b = np.asarray(p["fc3_b"], np.float32)

    # conv1 row-gather: row 32*di + 16*a + u selects image row 2u + a + di (u<=13).
    g1 = np.zeros((160, 32), np.float32)
    for di in range(5):
        for a in range(2):
            for u in range(14):
                g1[32 * di + 16 * a + u, 2 * u + a + di] = 1.0

    # conv1 block-Toeplitz: t1[2*di+b, 3*wp + c, 6*v + o] = w1[o, c, di, wp - (2v + b)].
    t1 = np.zeros((10, 96, 84), np.float32)
    for di in range(5):
        for b in range(2):
            k = 2 * di + b
            for v in range(14):
                for dj in range(5):
                    wp = 2 * v + b + dj
                    for c in range(3):
                        for o in range(6):
                            t1[k, 3 * wp + c, 6 * v + o] = w1[o, c, di, dj]
    b1r = np.tile(b1, 14)[None, :]                       # col 6v+o -> b1[o]

    # conv2 row-gather over the (16, 84) pooled conv1 activation (rows 0..13 valid).
    g2 = np.zeros((80, 16), np.float32)
    for di in range(5):
        for a in range(2):
            for u in range(5):
                g2[16 * di + 8 * a + u, 2 * u + a + di] = 1.0

    # conv2 block-Toeplitz: t2[2*di+b, 6*wp + c, 16*v + o] = w2[o, c, di, wp - (2v + b)].
    t2 = np.zeros((10, 84, 80), np.float32)
    for di in range(5):
        for b in range(2):
            k = 2 * di + b
            for v in range(5):
                for dj in range(5):
                    wp = 2 * v + b + dj
                    for c in range(6):
                        for o in range(16):
                            t2[k, 6 * wp + c, 16 * v + o] = w2[o, c, di, dj]
    b2r = np.tile(b2, 5)[None, :]                        # col 16v+o -> b2[o]

    # fc1 weight re-blocked to consume the (5, 80) pooled conv2 activation row by row:
    #   w1v[u, 16*v + o, n] = fc1_w[n, o*25 + u*5 + v]   (PyTorch (C,H,W) flatten order)
    w1v = np.zeros((5, 80, 120), np.float32)
    for u in range(5):
        for v in range(5):
            for o in range(16):
                w1v[u, 16 * v + o, :] = f1w[:, o * 25 + u * 5 + v]

    return {
        "g1": jnp.asarray(g1), "t1": jnp.asarray(t1), "b1r": jnp.asarray(b1r),
        "g2": jnp.asarray(g2), "t2": jnp.asarray(t2), "b2r": jnp.asarray(b2r),
        "w1v": jnp.asarray(w1v), "fb1": jnp.asarray(f1b[None, :]),
        "w2t": jnp.asarray(f2w.T), "fb2": jnp.asarray(f2b[None, :]),
        "w3t": jnp.asarray(f3w.T), "fb3": jnp.asarray(f3b[None, :]),
    }


# --------------------------- pure-JAX reference (PyTorch semantics) -----------

def net_forward_ref(x, p):
    def conv(x, w, b):
        y = jax.lax.conv_general_dilated(x, w, (1, 1), "VALID",
                                         dimension_numbers=("NCHW", "OIHW", "NCHW"))
        return jnp.tanh(y + b[None, :, None, None])

    def pool(x):
        return jax.lax.reduce_window(x, -jnp.inf, jax.lax.max,
                                     (1, 1, 2, 2), (1, 1, 2, 2), "VALID")

    x = pool(conv(x, p["conv1_w"], p["conv1_b"]))
    x = pool(conv(x, p["conv2_w"], p["conv2_b"]))
    x = x.reshape(x.shape[0], 400)
    x = jnp.tanh(x @ p["fc1_w"].T + p["fc1_b"])
    x = jnp.tanh(x @ p["fc2_w"].T + p["fc2_b"])
    x = x @ p["fc3_w"].T + p["fc3_b"]
    return jax.nn.log_softmax(x, axis=-1)


if __name__ == "__main__":
    key = jax.random.PRNGKey(0)
    k_x, k_p = jax.random.split(key)
    # Forward pass implies 32x32 inputs (32-5+1=28 ->14 -5+1=10 ->5; 16*5*5=400).
    x = jax.random.normal(k_x, (2, 3, 32, 32), jnp.float32)
    params = init_params(k_p)
    kparams = prepare_params(params)

    out = jax.block_until_ready(jax.jit(net_forward)(x, kparams))
    ref = jax.block_until_ready(net_forward_ref(x, params))

    assert out.shape == (2, 10)
    np.testing.assert_allclose(np.asarray(out), np.asarray(ref), atol=2e-2, rtol=2e-2)
    print("KERNEL_OK")
</pallas_src>

<mosaic_0001>
module attributes {stable_mosaic.version = 11 : i64} {
  func.func @_net_kernel(%arg0: i32, %arg1: memref<1x32x96xf32, #tpu.memory_space<vmem>>, %arg2: memref<160x32xf32, #tpu.memory_space<vmem>>, %arg3: memref<10x96x84xf32, #tpu.memory_space<vmem>>, %arg4: memref<1x84xf32, #tpu.memory_space<vmem>>, %arg5: memref<80x16xf32, #tpu.memory_space<vmem>>, %arg6: memref<10x84x80xf32, #tpu.memory_space<vmem>>, %arg7: memref<1x80xf32, #tpu.memory_space<vmem>>, %arg8: memref<5x80x120xf32, #tpu.memory_space<vmem>>, %arg9: memref<1x120xf32, #tpu.memory_space<vmem>>, %arg10: memref<120x84xf32, #tpu.memory_space<vmem>>, %arg11: memref<1x84xf32, #tpu.memory_space<vmem>>, %arg12: memref<84x10xf32, #tpu.memory_space<vmem>>, %arg13: memref<1x10xf32, #tpu.memory_space<vmem>>, %arg14: memref<1x1x10xf32, #tpu.memory_space<vmem>>) attributes {dimension_semantics = [#tpu.dimension_semantics<parallel>], iteration_bounds = array<i64: 2>, scalar_prefetch = 0 : i64, scratch_operands = 0 : i64, tpu.core_type = #tpu.core_type<tc>, window_params = [{transform_indices = @transform_0, window_bounds = array<i64: 1, 32, 96>}, {pipeline_mode = #tpu.pipeline_mode<synchronous>, transform_indices = @transform_1, window_bounds = array<i64: 160, 32>}, {pipeline_mode = #tpu.pipeline_mode<synchronous>, transform_indices = @transform_2, window_bounds = array<i64: 10, 96, 84>}, {pipeline_mode = #tpu.pipeline_mode<synchronous>, transform_indices = @transform_3, window_bounds = array<i64: 1, 84>}, {pipeline_mode = #tpu.pipeline_mode<synchronous>, transform_indices = @transform_4, window_bounds = array<i64: 80, 16>}, {pipeline_mode = #tpu.pipeline_mode<synchronous>, transform_indices = @transform_5, window_bounds = array<i64: 10, 84, 80>}, {pipeline_mode = #tpu.pipeline_mode<synchronous>, transform_indices = @transform_6, window_bounds = array<i64: 1, 80>}, {pipeline_mode = #tpu.pipeline_mode<synchronous>, transform_indices = @transform_7, window_bounds = array<i64: 5, 80, 120>}, {pipeline_mode = #tpu.pipeline_mode<synchronous>, transform_indices = @transform_8, window_bounds = array<i64: 1, 120>}, {pipeline_mode = #tpu.pipeline_mode<synchronous>, transform_indices = @transform_9, window_bounds = array<i64: 120, 84>}, {pipeline_mode = #tpu.pipeline_mode<synchronous>, transform_indices = @transform_10, window_bounds = array<i64: 1, 84>}, {pipeline_mode = #tpu.pipeline_mode<synchronous>, transform_indices = @transform_11, window_bounds = array<i64: 84, 10>}, {pipeline_mode = #tpu.pipeline_mode<synchronous>, transform_indices = @transform_12, window_bounds = array<i64: 1, 10>}, {transform_indices = @transform_13, window_bounds = array<i64: 1, 1, 10>}]} {
    %c0 = arith.constant 0 : index
    %c0_0 = arith.constant 0 : index
    %c0_1 = arith.constant 0 : index
    %0 = vector.load %arg1[%c0, %c0_0, %c0_1] : memref<1x32x96xf32, #tpu.memory_space<vmem>>, vector<1x32x96xf32>
    %1 = vector.shape_cast %0 : vector<1x32x96xf32> to vector<32x96xf32>
    %c0_2 = arith.constant 0 : index
    %c0_3 = arith.constant 0 : index
    %2 = vector.load %arg2[%c0_2, %c0_3] : memref<160x32xf32, #tpu.memory_space<vmem>>, vector<160x32xf32>
    %cst = arith.constant dense<0.000000e+00> : vector<160x96xf32>
    %3 = tpu.matmul %2, %1, %cst {dimension_numbers = #tpu.dot_dimension_numbers<[1], [0], [0], [1], [0, 0, 1, 1], [], []>} : vector<160x32xf32>, vector<32x96xf32>, vector<160x96xf32> -> vector<160x96xf32>
    %4 = vector.extract_strided_slice %3 {offsets = [0, 0], sizes = [32, 96], strides = [1, 1]} : vector<160x96xf32> to vector<32x96xf32>
    %c0_4 = arith.constant 0 : index
    %c0_5 = arith.constant 0 : index
    %c0_6 = arith.constant 0 : index
    %5 = vector.load %arg3[%c0_4, %c0_5, %c0_6] : memref<10x96x84xf32, #tpu.memory_space<vmem>>, vector<1x96x84xf32>
    %6 = vector.shape_cast %5 : vector<1x96x84xf32> to vector<96x84xf32>
    %cst_7 = arith.constant dense<0.000000e+00> : vector<32x84xf32>
    %7 = tpu.matmul %4, %6, %cst_7 {dimension_numbers = #tpu.dot_dimension_numbers<[1], [0], [0], [1], [0, 0, 1, 1], [], []>} : vector<32x96xf32>, vector<96x84xf32>, vector<32x84xf32> -> vector<32x84xf32>
    %8 = vector.extract_strided_slice %3 {offsets = [0, 0], sizes = [32, 96], strides = [1, 1]} : vector<160x96xf32> to vector<32x96xf32>
    %c1 = arith.constant 1 : index
    %c0_8 = arith.constant 0 : index
    %c0_9 = arith.constant 0 : index
    %9 = vector.load %arg3[%c1, %c0_8, %c0_9] : memref<10x96x84xf32, #tpu.memory_space<vmem>>, vector<1x96x84xf32>
    %10 = vector.shape_cast %9 : vector<1x96x84xf32> to vector<96x84xf32>
    %cst_10 = arith.constant dense<0.000000e+00> : vector<32x84xf32>
    %11 = tpu.matmul %8, %10, %cst_10 {dimension_numbers = #tpu.dot_dimension_numbers<[1], [0], [0], [1], [0, 0, 1, 1], [], []>} : vector<32x96xf32>, vector<96x84xf32>, vector<32x84xf32> -> vector<32x84xf32>
    %12 = vector.extract_strided_slice %3 {offsets = [32, 0], sizes = [32, 96], strides = [1, 1]} : vector<160x96xf32> to vector<32x96xf32>
    %c2 = arith.constant 2 : index
    %c0_11 = arith.constant 0 : index
    %c0_12 = arith.constant 0 : index
    %13 = vector.load %arg3[%c2, %c0_11, %c0_12] : memref<10x96x84xf32, #tpu.memory_space<vmem>>, vector<1x96x84xf32>
    %14 = vector.shape_cast %13 : vector<1x96x84xf32> to vector<96x84xf32>
    %cst_13 = arith.constant dense<0.000000e+00> : vector<32x84xf32>
    %15 = tpu.matmul %12, %14, %cst_13 {dimension_numbers = #tpu.dot_dimension_numbers<[1], [0], [0], [1], [0, 0, 1, 1], [], []>} : vector<32x96xf32>, vector<96x84xf32>, vector<32x84xf32> -> vector<32x84xf32>
    %16 = arith.addf %7, %15 : vector<32x84xf32>
    %c3 = arith.constant 3 : index
    %c0_14 = arith.constant 0 : index
    %c0_15 = arith.constant 0 : index
    %17 = vector.load %arg3[%c3, %c0_14, %c0_15] : memref<10x96x84xf32, #tpu.memory_space<vmem>>, vector<1x96x84xf32>
    %18 = vector.shape_cast %17 : vector<1x96x84xf32> to vector<96x84xf32>
    %cst_16 = arith.constant dense<0.000000e+00> : vector<32x84xf32>
    %19 = tpu.matmul %12, %18, %cst_16 {dimension_numbers = #tpu.dot_dimension_numbers<[1], [0], [0], [1], [0, 0, 1, 1], [], []>} : vector<32x96xf32>, vector<96x84xf32>, vector<32x84xf32> -> vector<32x84xf32>
    %20 = arith.addf %11, %19 : vector<32x84xf32>
    %21 = vector.extract_strided_slice %3 {offsets = [64, 0], sizes = [32, 96], strides = [1, 1]} : vector<160x96xf32> to vector<32x96xf32>
    %c4 = arith.constant 4 : index
    %c0_17 = arith.constant 0 : index
    %c0_18 = arith.constant 0 : index
    %22 = vector.load %arg3[%c4, %c0_17, %c0_18] : memref<10x96x84xf32, #tpu.memory_space<vmem>>, vector<1x96x84xf32>
    %23 = vector.shape_cast %22 : vector<1x96x84xf32> to vector<96x84xf32>
    %cst_19 = arith.constant dense<0.000000e+00> : vector<32x84xf32>
    %24 = tpu.matmul %21, %23, %cst_19 {dimension_numbers = #tpu.dot_dimension_numbers<[1], [0], [0], [1], [0, 0, 1, 1], [], []>} : vector<32x96xf32>, vector<96x84xf32>, vector<32x84xf32> -> vector<32x84xf32>
    %25 = arith.addf %16, %24 : vector<32x84xf32>
    %c5 = arith.constant 5 : index
    %c0_20 = arith.constant 0 : index
    %c0_21 = arith.constant 0 : index
    %26 = vector.load %arg3[%c5, %c0_20, %c0_21] : memref<10x96x84xf32, #tpu.memory_space<vmem>>, vector<1x96x84xf32>
    %27 = vector.shape_cast %26 : vector<1x96x84xf32> to vector<96x84xf32>
    %cst_22 = arith.constant dense<0.000000e+00> : vector<32x84xf32>
    %28 = tpu.matmul %21, %27, %cst_22 {dimension_numbers = #tpu.dot_dimension_numbers<[1], [0], [0], [1], [0, 0, 1, 1], [], []>} : vector<32x96xf32>, vector<96x84xf32>, vector<32x84xf32> -> vector<32x84xf32>
    %29 = arith.addf %20, %28 : vector<32x84xf32>
    %30 = vector.extract_strided_slice %3 {offsets = [96, 0], sizes = [32, 96], strides = [1, 1]} : vector<160x96xf32> to vector<32x96xf32>
    %c6 = arith.constant 6 : index
    %c0_23 = arith.constant 0 : index
    %c0_24 = arith.constant 0 : index
    %31 = vector.load %arg3[%c6, %c0_23, %c0_24] : memref<10x96x84xf32, #tpu.memory_space<vmem>>, vector<1x96x84xf32>
    %32 = vector.shape_cast %31 : vector<1x96x84xf32> to vector<96x84xf32>
    %cst_25 = arith.constant dense<0.000000e+00> : vector<32x84xf32>
    %33 = tpu.matmul %30, %32, %cst_25 {dimension_numbers = #tpu.dot_dimension_numbers<[1], [0], [0], [1], [0, 0, 1, 1], [], []>} : vector<32x96xf32>, vector<96x84xf32>, vector<32x84xf32> -> vector<32x84xf32>
    %34 = arith.addf %25, %33 : vector<32x84xf32>
    %c7 = arith.constant 7 : index
    %c0_26 = arith.constant 0 : index
    %c0_27 = arith.constant 0 : index
    %35 = vector.load %arg3[%c7, %c0_26, %c0_27] : memref<10x96x84xf32, #tpu.memory_space<vmem>>, vector<1x96x84xf32>
    %36 = vector.shape_cast %35 : vector<1x96x84xf32> to vector<96x84xf32>
    %cst_28 = arith.constant dense<0.000000e+00> : vector<32x84xf32>
    %37 = tpu.matmul %30, %36, %cst_28 {dimension_numbers = #tpu.dot_dimension_numbers<[1], [0], [0], [1], [0, 0, 1, 1], [], []>} : vector<32x96xf32>, vector<96x84xf32>, vector<32x84xf32> -> vector<32x84xf32>
    %38 = arith.addf %29, %37 : vector<32x84xf32>
    %39 = vector.extract_strided_slice %3 {offsets = [128, 0], sizes = [32, 96], strides = [1, 1]} : vector<160x96xf32> to vector<32x96xf32>
    %c8 = arith.constant 8 : index
    %c0_29 = arith.constant 0 : index
    %c0_30 = arith.constant 0 : index
    %40 = vector.load %arg3[%c8, %c0_29, %c0_30] : memref<10x96x84xf32, #tpu.memory_space<vmem>>, vector<1x96x84xf32>
    %41 = vector.shape_cast %40 : vector<1x96x84xf32> to vector<96x84xf32>
    %cst_31 = arith.constant dense<0.000000e+00> : vector<32x84xf32>
    %42 = tpu.matmul %39, %41, %cst_31 {dimension_numbers = #tpu.dot_dimension_numbers<[1], [0], [0], [1], [0, 0, 1, 1], [], []>} : vector<32x96xf32>, vector<96x84xf32>, vector<32x84xf32> -> vector<32x84xf32>
    %43 = arith.addf %34, %42 : vector<32x84xf32>
    %c9 = arith.constant 9 : index
    %c0_32 = arith.constant 0 : index
    %c0_33 = arith.constant 0 : index
    %44 = vector.load %arg3[%c9, %c0_32, %c0_33] : memref<10x96x84xf32, #tpu.memory_space<vmem>>, vector<1x96x84xf32>
    %45 = vector.shape_cast %44 : vector<1x96x84xf32> to vector<96x84xf32>
    %cst_34 = arith.constant dense<0.000000e+00> : vector<32x84xf32>
    %46 = tpu.matmul %39, %45, %cst_34 {dimension_numbers = #tpu.dot_dimension_numbers<[1], [0], [0], [1], [0, 0, 1, 1], [], []>} : vector<32x96xf32>, vector<96x84xf32>, vector<32x84xf32> -> vector<32x84xf32>
    %47 = arith.addf %38, %46 : vector<32x84xf32>
    %48 = vector.extract_strided_slice %43 {offsets = [0, 0], sizes = [16, 84], strides = [1, 1]} : vector<32x84xf32> to vector<16x84xf32>
    %49 = vector.extract_strided_slice %43 {offsets = [16, 0], sizes = [16, 84], strides = [1, 1]} : vector<32x84xf32> to vector<16x84xf32>
    %50 = arith.maximumf %48, %49 : vector<16x84xf32>
    %51 = vector.extract_strided_slice %47 {offsets = [0, 0], sizes = [16, 84], strides = [1, 1]} : vector<32x84xf32> to vector<16x84xf32>
    %52 = vector.extract_strided_slice %47 {offsets = [16, 0], sizes = [16, 84], strides = [1, 1]} : vector<32x84xf32> to vector<16x84xf32>
    %53 = arith.maximumf %51, %52 : vector<16x84xf32>
    %54 = arith.maximumf %50, %53 : vector<16x84xf32>
    %c0_35 = arith.constant 0 : index
    %c0_36 = arith.constant 0 : index
    %55 = vector.load %arg4[%c0_35, %c0_36] : memref<1x84xf32, #tpu.memory_space<vmem>>, vector<1x84xf32>
    %56 = vector.broadcast %55 : vector<1x84xf32> to vector<16x84xf32>
    %57 = arith.addf %54, %56 : vector<16x84xf32>
    %58 = math.tanh %57 : vector<16x84xf32>
    %c0_37 = arith.constant 0 : index
    %c0_38 = arith.constant 0 : index
    %59 = vector.load %arg5[%c0_37, %c0_38] : memref<80x16xf32, #tpu.memory_space<vmem>>, vector<80x16xf32>
    %cst_39 = arith.constant dense<0.000000e+00> : vector<80x84xf32>
    %60 = tpu.matmul %59, %58, %cst_39 {dimension_numbers = #tpu.dot_dimension_numbers<[1], [0], [0], [1], [0, 0, 1, 1], [], []>} : vector<80x16xf32>, vector<16x84xf32>, vector<80x84xf32> -> vector<80x84xf32>
    %61 = vector.extract_strided_slice %60 {offsets = [0, 0], sizes = [16, 84], strides = [1, 1]} : vector<80x84xf32> to vector<16x84xf32>
    %c0_40 = arith.constant 0 : index
    %c0_41 = arith.constant 0 : index
    %c0_42 = arith.constant 0 : index
    %62 = vector.load %arg6[%c0_40, %c0_41, %c0_42] : memref<10x84x80xf32, #tpu.memory_space<vmem>>, vector<1x84x80xf32>
    %63 = vector.shape_cast %62 : vector<1x84x80xf32> to vector<84x80xf32>
    %cst_43 = arith.constant dense<0.000000e+00> : vector<16x80xf32>
    %64 = tpu.matmul %61, %63, %cst_43 {dimension_numbers = #tpu.dot_dimension_numbers<[1], [0], [0], [1], [0, 0, 1, 1], [], []>} : vector<16x84xf32>, vector<84x80xf32>, vector<16x80xf32> -> vector<16x80xf32>
    %65 = vector.extract_strided_slice %60 {offsets = [0, 0], sizes = [16, 84], strides = [1, 1]} : vector<80x84xf32> to vector<16x84xf32>
    %c1_44 = arith.constant 1 : index
    %c0_45 = arith.constant 0 : index
    %c0_46 = arith.constant 0 : index
    %66 = vector.load %arg6[%c1_44, %c0_45, %c0_46] : memref<10x84x80xf32, #tpu.memory_space<vmem>>, vector<1x84x80xf32>
    %67 = vector.shape_cast %66 : vector<1x84x80xf32> to vector<84x80xf32>
    %cst_47 = arith.constant dense<0.000000e+00> : vector<16x80xf32>
    %68 = tpu.matmul %65, %67, %cst_47 {dimension_numbers = #tpu.dot_dimension_numbers<[1], [0], [0], [1], [0, 0, 1, 1], [], []>} : vector<16x84xf32>, vector<84x80xf32>, vector<16x80xf32> -> vector<16x80xf32>
    %69 = vector.extract_strided_slice %60 {offsets = [16, 0], sizes = [16, 84], strides = [1, 1]} : vector<80x84xf32> to vector<16x84xf32>
    %c2_48 = arith.constant 2 : index
    %c0_49 = arith.constant 0 : index
    %c0_50 = arith.constant 0 : index
    %70 = vector.load %arg6[%c2_48, %c0_49, %c0_50] : memref<10x84x80xf32, #tpu.memory_space<vmem>>, vector<1x84x80xf32>
    %71 = vector.shape_cast %70 : vector<1x84x80xf32> to vector<84x80xf32>
    %cst_51 = arith.constant dense<0.000000e+00> : vector<16x80xf32>
    %72 = tpu.matmul %69, %71, %cst_51 {dimension_numbers = #tpu.dot_dimension_numbers<[1], [0], [0], [1], [0, 0, 1, 1], [], []>} : vector<16x84xf32>, vector<84x80xf32>, vector<16x80xf32> -> vector<16x80xf32>
    %73 = arith.addf %64, %72 : vector<16x80xf32>
    %c3_52 = arith.constant 3 : index
    %c0_53 = arith.constant 0 : index
    %c0_54 = arith.constant 0 : index
    %74 = vector.load %arg6[%c3_52, %c0_53, %c0_54] : memref<10x84x80xf32, #tpu.memory_space<vmem>>, vector<1x84x80xf32>
    %75 = vector.shape_cast %74 : vector<1x84x80xf32> to vector<84x80xf32>
    %cst_55 = arith.constant dense<0.000000e+00> : vector<16x80xf32>
    %76 = tpu.matmul %69, %75, %cst_55 {dimension_numbers = #tpu.dot_dimension_numbers<[1], [0], [0], [1], [0, 0, 1, 1], [], []>} : vector<16x84xf32>, vector<84x80xf32>, vector<16x80xf32> -> vector<16x80xf32>
    %77 = arith.addf %68, %76 : vector<16x80xf32>
    %78 = vector.extract_strided_slice %60 {offsets = [32, 0], sizes = [16, 84], strides = [1, 1]} : vector<80x84xf32> to vector<16x84xf32>
    %c4_56 = arith.constant 4 : index
    %c0_57 = arith.constant 0 : index
    %c0_58 = arith.constant 0 : index
    %79 = vector.load %arg6[%c4_56, %c0_57, %c0_58] : memref<10x84x80xf32, #tpu.memory_space<vmem>>, vector<1x84x80xf32>
    %80 = vector.shape_cast %79 : vector<1x84x80xf32> to vector<84x80xf32>
    %cst_59 = arith.constant dense<0.000000e+00> : vector<16x80xf32>
    %81 = tpu.matmul %78, %80, %cst_59 {dimension_numbers = #tpu.dot_dimension_numbers<[1], [0], [0], [1], [0, 0, 1, 1], [], []>} : vector<16x84xf32>, vector<84x80xf32>, vector<16x80xf32> -> vector<16x80xf32>
    %82 = arith.addf %73, %81 : vector<16x80xf32>
    %c5_60 = arith.constant 5 : index
    %c0_61 = arith.constant 0 : index
    %c0_62 = arith.constant 0 : index
    %83 = vector.load %arg6[%c5_60, %c0_61, %c0_62] : memref<10x84x80xf32, #tpu.memory_space<vmem>>, vector<1x84x80xf32>
    %84 = vector.shape_cast %83 : vector<1x84x80xf32> to vector<84x80xf32>
    %cst_63 = arith.constant dense<0.000000e+00> : vector<16x80xf32>
    %85 = tpu.matmul %78, %84, %cst_63 {dimension_numbers = #tpu.dot_dimension_numbers<[1], [0], [0], [1], [0, 0, 1, 1], [], []>} : vector<16x84xf32>, vector<84x80xf32>, vector<16x80xf32> -> vector<16x80xf32>
    %86 = arith.addf %77, %85 : vector<16x80xf32>
    %87 = vector.extract_strided_slice %60 {offsets = [48, 0], sizes = [16, 84], strides = [1, 1]} : vector<80x84xf32> to vector<16x84xf32>
    %c6_64 = arith.constant 6 : index
    %c0_65 = arith.constant 0 : index
    %c0_66 = arith.constant 0 : index
    %88 = vector.load %arg6[%c6_64, %c0_65, %c0_66] : memref<10x84x80xf32, #tpu.memory_space<vmem>>, vector<1x84x80xf32>
    %89 = vector.shape_cast %88 : vector<1x84x80xf32> to vector<84x80xf32>
    %cst_67 = arith.constant dense<0.000000e+00> : vector<16x80xf32>
    %90 = tpu.matmul %87, %89, %cst_67 {dimension_numbers = #tpu.dot_dimension_numbers<[1], [0], [0], [1], [0, 0, 1, 1], [], []>} : vector<16x84xf32>, vector<84x80xf32>, vector<16x80xf32> -> vector<16x80xf32>
    %91 = arith.addf %82, %90 : vector<16x80xf32>
    %c7_68 = arith.constant 7 : index
    %c0_69 = arith.constant 0 : index
    %c0_70 = arith.constant 0 : index
    %92 = vector.load %arg6[%c7_68, %c0_69, %c0_70] : memref<10x84x80xf32, #tpu.memory_space<vmem>>, vector<1x84x80xf32>
    %93 = vector.shape_cast %92 : vector<1x84x80xf32> to vector<84x80xf32>
    %cst_71 = arith.constant dense<0.000000e+00> : vector<16x80xf32>
    %94 = tpu.matmul %87, %93, %cst_71 {dimension_numbers = #tpu.dot_dimension_numbers<[1], [0], [0], [1], [0, 0, 1, 1], [], []>} : vector<16x84xf32>, vector<84x80xf32>, vector<16x80xf32> -> vector<16x80xf32>
    %95 = arith.addf %86, %94 : vector<16x80xf32>
    %96 = vector.extract_strided_slice %60 {offsets = [64, 0], sizes = [16, 84], strides = [1, 1]} : vector<80x84xf32> to vector<16x84xf32>
    %c8_72 = arith.constant 8 : index
    %c0_73 = arith.constant 0 : index
    %c0_74 = arith.constant 0 : index
    %97 = vector.load %arg6[%c8_72, %c0_73, %c0_74] : memref<10x84x80xf32, #tpu.memory_space<vmem>>, vector<1x84x80xf32>
    %98 = vector.shape_cast %97 : vector<1x84x80xf32> to vector<84x80xf32>
    %cst_75 = arith.constant dense<0.000000e+00> : vector<16x80xf32>
    %99 = tpu.matmul %96, %98, %cst_75 {dimension_numbers = #tpu.dot_dimension_numbers<[1], [0], [0], [1], [0, 0, 1, 1], [], []>} : vector<16x84xf32>, vector<84x80xf32>, vector<16x80xf32> -> vector<16x80xf32>
    %100 = arith.addf %91, %99 : vector<16x80xf32>
    %c9_76 = arith.constant 9 : index
    %c0_77 = arith.constant 0 : index
    %c0_78 = arith.constant 0 : index
    %101 = vector.load %arg6[%c9_76, %c0_77, %c0_78] : memref<10x84x80xf32, #tpu.memory_space<vmem>>, vector<1x84x80xf32>
    %102 = vector.shape_cast %101 : vector<1x84x80xf32> to vector<84x80xf32>
    %cst_79 = arith.constant dense<0.000000e+00> : vector<16x80xf32>
    %103 = tpu.matmul %96, %102, %cst_79 {dimension_numbers = #tpu.dot_dimension_numbers<[1], [0], [0], [1], [0, 0, 1, 1], [], []>} : vector<16x84xf32>, vector<84x80xf32>, vector<16x80xf32> -> vector<16x80xf32>
    %104 = arith.addf %95, %103 : vector<16x80xf32>
    %105 = vector.extract_strided_slice %100 {offsets = [0, 0], sizes = [8, 80], strides = [1, 1]} : vector<16x80xf32> to vector<8x80xf32>
    %106 = vector.extract_strided_slice %100 {offsets = [8, 0], sizes = [8, 80], strides = [1, 1]} : vector<16x80xf32> to vector<8x80xf32>
    %107 = arith.maximumf %105, %106 : vector<8x80xf32>
    %108 = vector.extract_strided_slice %104 {offsets = [0, 0], sizes = [8, 80], strides = [1, 1]} : vector<16x80xf32> to vector<8x80xf32>
    %109 = vector.extract_strided_slice %104 {offsets = [8, 0], sizes = [8, 80], strides = [1, 1]} : vector<16x80xf32> to vector<8x80xf32>
    %110 = arith.maximumf %108, %109 : vector<8x80xf32>
    %111 = arith.maximumf %107, %110 : vector<8x80xf32>
    %c0_80 = arith.constant 0 : index
    %c0_81 = arith.constant 0 : index
    %112 = vector.load %arg7[%c0_80, %c0_81] : memref<1x80xf32, #tpu.memory_space<vmem>>, vector<1x80xf32>
    %113 = vector.broadcast %112 : vector<1x80xf32> to vector<8x80xf32>
    %114 = arith.addf %111, %113 : vector<8x80xf32>
    %115 = math.tanh %114 : vector<8x80xf32>
    %116 = vector.extract_strided_slice %115 {offsets = [0, 0], sizes = [1, 80], strides = [1, 1]} : vector<8x80xf32> to vector<1x80xf32>
    %c0_82 = arith.constant 0 : index
    %c0_83 = arith.constant 0 : index
    %c0_84 = arith.constant 0 : index
    %117 = vector.load %arg8[%c0_82, %c0_83, %c0_84] : memref<5x80x120xf32, #tpu.memory_space<vmem>>, vector<1x80x120xf32>
    %118 = vector.shape_cast %117 : vector<1x80x120xf32> to vector<80x120xf32>
    %cst_85 = arith.constant dense<0.000000e+00> : vector<1x120xf32>
    %119 = tpu.matmul %116, %118, %cst_85 {dimension_numbers = #tpu.dot_dimension_numbers<[1], [0], [0], [1], [0, 0, 1, 1], [], []>} : vector<1x80xf32>, vector<80x120xf32>, vector<1x120xf32> -> vector<1x120xf32>
    %120 = vector.extract_strided_slice %115 {offsets = [1, 0], sizes = [1, 80], strides = [1, 1]} : vector<8x80xf32> to vector<1x80xf32>
    %c1_86 = arith.constant 1 : index
    %c0_87 = arith.constant 0 : index
    %c0_88 = arith.constant 0 : index
    %121 = vector.load %arg8[%c1_86, %c0_87, %c0_88] : memref<5x80x120xf32, #tpu.memory_space<vmem>>, vector<1x80x120xf32>
    %122 = vector.shape_cast %121 : vector<1x80x120xf32> to vector<80x120xf32>
    %cst_89 = arith.constant dense<0.000000e+00> : vector<1x120xf32>
    %123 = tpu.matmul %120, %122, %cst_89 {dimension_numbers = #tpu.dot_dimension_numbers<[1], [0], [0], [1], [0, 0, 1, 1], [], []>} : vector<1x80xf32>, vector<80x120xf32>, vector<1x120xf32> -> vector<1x120xf32>
    %124 = arith.addf %119, %123 : vector<1x120xf32>
    %125 = vector.extract_strided_slice %115 {offsets = [2, 0], sizes = [1, 80], strides = [1, 1]} : vector<8x80xf32> to vector<1x80xf32>
    %c2_90 = arith.constant 2 : index
    %c0_91 = arith.constant 0 : index
    %c0_92 = arith.constant 0 : index
    %126 = vector.load %arg8[%c2_90, %c0_91, %c0_92] : memref<5x80x120xf32, #tpu.memory_space<vmem>>, vector<1x80x120xf32>
    %127 = vector.shape_cast %126 : vector<1x80x120xf32> to vector<80x120xf32>
    %cst_93 = arith.constant dense<0.000000e+00> : vector<1x120xf32>
    %128 = tpu.matmul %125, %127, %cst_93 {dimension_numbers = #tpu.dot_dimension_numbers<[1], [0], [0], [1], [0, 0, 1, 1], [], []>} : vector<1x80xf32>, vector<80x120xf32>, vector<1x120xf32> -> vector<1x120xf32>
    %129 = arith.addf %124, %128 : vector<1x120xf32>
    %130 = vector.extract_strided_slice %115 {offsets = [3, 0], sizes = [1, 80], strides = [1, 1]} : vector<8x80xf32> to vector<1x80xf32>
    %c3_94 = arith.constant 3 : index
    %c0_95 = arith.constant 0 : index
    %c0_96 = arith.constant 0 : index
    %131 = vector.load %arg8[%c3_94, %c0_95, %c0_96] : memref<5x80x120xf32, #tpu.memory_space<vmem>>, vector<1x80x120xf32>
    %132 = vector.shape_cast %131 : vector<1x80x120xf32> to vector<80x120xf32>
    %cst_97 = arith.constant dense<0.000000e+00> : vector<1x120xf32>
    %133 = tpu.matmul %130, %132, %cst_97 {dimension_numbers = #tpu.dot_dimension_numbers<[1], [0], [0], [1], [0, 0, 1, 1], [], []>} : vector<1x80xf32>, vector<80x120xf32>, vector<1x120xf32> -> vector<1x120xf32>
    %134 = arith.addf %129, %133 : vector<1x120xf32>
    %135 = vector.extract_strided_slice %115 {offsets = [4, 0], sizes = [1, 80], strides = [1, 1]} : vector<8x80xf32> to vector<1x80xf32>
    %c4_98 = arith.constant 4 : index
    %c0_99 = arith.constant 0 : index
    %c0_100 = arith.constant 0 : index
    %136 = vector.load %arg8[%c4_98, %c0_99, %c0_100] : memref<5x80x120xf32, #tpu.memory_space<vmem>>, vector<1x80x120xf32>
    %137 = vector.shape_cast %136 : vector<1x80x120xf32> to vector<80x120xf32>
    %cst_101 = arith.constant dense<0.000000e+00> : vector<1x120xf32>
    %138 = tpu.matmul %135, %137, %cst_101 {dimension_numbers = #tpu.dot_dimension_numbers<[1], [0], [0], [1], [0, 0, 1, 1], [], []>} : vector<1x80xf32>, vector<80x120xf32>, vector<1x120xf32> -> vector<1x120xf32>
    %139 = arith.addf %134, %138 : vector<1x120xf32>
    %c0_102 = arith.constant 0 : index
    %c0_103 = arith.constant 0 : index
    %140 = vector.load %arg9[%c0_102, %c0_103] : memref<1x120xf32, #tpu.memory_space<vmem>>, vector<1x120xf32>
    %141 = arith.addf %139, %140 : vector<1x120xf32>
    %142 = math.tanh %141 : vector<1x120xf32>
    %c0_104 = arith.constant 0 : index
    %c0_105 = arith.constant 0 : index
    %143 = vector.load %arg10[%c0_104, %c0_105] : memref<120x84xf32, #tpu.memory_space<vmem>>, vector<120x84xf32>
    %cst_106 = arith.constant dense<0.000000e+00> : vector<1x84xf32>
    %144 = tpu.matmul %142, %143, %cst_106 {dimension_numbers = #tpu.dot_dimension_numbers<[1], [0], [0], [1], [0, 0, 1, 1], [], []>} : vector<1x120xf32>, vector<120x84xf32>, vector<1x84xf32> -> vector<1x84xf32>
    %c0_107 = arith.constant 0 : index
    %c0_108 = arith.constant 0 : index
    %145 = vector.load %arg11[%c0_107, %c0_108] : memref<1x84xf32, #tpu.memory_space<vmem>>, vector<1x84xf32>
    %146 = arith.addf %144, %145 : vector<1x84xf32>
    %147 = math.tanh %146 : vector<1x84xf32>
    %c0_109 = arith.constant 0 : index
    %c0_110 = arith.constant 0 : index
    %148 = vector.load %arg12[%c0_109, %c0_110] : memref<84x10xf32, #tpu.memory_space<vmem>>, vector<84x10xf32>
    %cst_111 = arith.constant dense<0.000000e+00> : vector<1x10xf32>
    %149 = tpu.matmul %147, %148, %cst_111 {dimension_numbers = #tpu.dot_dimension_numbers<[1], [0], [0], [1], [0, 0, 1, 1], [], []>} : vector<1x84xf32>, vector<84x10xf32>, vector<1x10xf32> -> vector<1x10xf32>
    %c0_112 = arith.constant 0 : index
    %c0_113 = arith.constant 0 : index
    %150 = vector.load %arg13[%c0_112, %c0_113] : memref<1x10xf32, #tpu.memory_space<vmem>>, vector<1x10xf32>
    %151 = arith.addf %149, %150 : vector<1x10xf32>
    %cst_114 = arith.constant dense<0xFF800000> : vector<1xf32>
    %152 = vector.multi_reduction <maximumf>, %151, %cst_114 [1] : vector<1x10xf32> to vector<1xf32>
    %153 = vector.shape_cast %152 : vector<1xf32> to vector<1x1xf32>
    %154 = vector.broadcast %153 : vector<1x1xf32> to vector<1x10xf32>
    %155 = arith.subf %151, %154 : vector<1x10xf32>
    %156 = math.exp %155 : vector<1x10xf32>
    %cst_115 = arith.constant dense<0.000000e+00> : vector<1xf32>
    %157 = vector.multi_reduction <add>, %156, %cst_115 [1] : vector<1x10xf32> to vector<1xf32>
    %158 = vector.shape_cast %157 : vector<1xf32> to vector<1x1xf32>
    %159 = math.log %158 : vector<1x1xf32>
    %160 = vector.broadcast %159 : vector<1x1xf32> to vector<1x10xf32>
    %161 = arith.subf %155, %160 : vector<1x10xf32>
    %c0_116 = arith.constant 0 : index
    %c0_117 = arith.constant 0 : index
    %c0_118 = arith.constant 0 : index
    %162 = vector.load %arg14[%c0_116, %c0_117, %c0_118] : memref<1x1x10xf32, #tpu.memory_space<vmem>>, vector<1x1x10xf32>
    %163 = vector.shape_cast %162 : vector<1x1x10xf32> to vector<1x10xf32>
    %164 = vector.shape_cast %161 : vector<1x10xf32> to vector<1x1x10xf32>
    tpu.vector_store %arg14[%c0_116, %c0_117, %c0_118], %164 {strides = array<i32>} : memref<1x1x10xf32, #tpu.memory_space<vmem>>, vector<1x1x10xf32>,
    return
  }
  func.func @transform_0(%arg0: i32) -> (i32, i32, i32) {
    %c0_i32 = arith.constant 0 : i32
    %c0_i32_0 = arith.constant 0 : i32
    %c0_i32_1 = arith.constant 0 : i32
    return %arg0, %c0_i32, %c0_i32_0 : i32, i32, i32
  }
  func.func @transform_1(%arg0: i32) -> (i32, i32) {
    %c0_i32 = arith.constant 0 : i32
    %c0_i32_0 = arith.constant 0 : i32
    %c0_i32_1 = arith.constant 0 : i32
    return %c0_i32, %c0_i32_0 : i32, i32
  }
  func.func @transform_2(%arg0: i32) -> (i32, i32, i32) {
    %c0_i32 = arith.constant 0 : i32
    %c0_i32_0 = arith.constant 0 : i32
    %c0_i32_1 = arith.constant 0 : i32
    %c0_i32_2 = arith.constant 0 : i32
    return %c0_i32, %c0_i32_0, %c0_i32_1 : i32, i32, i32
  }
  func.func @transform_3(%arg0: i32) -> (i32, i32) {
    %c0_i32 = arith.constant 0 : i32
    %c0_i32_0 = arith.constant 0 : i32
    %c0_i32_1 = arith.constant 0 : i32
    return %c0_i32, %c0_i32_0 : i32, i32
  }
  func.func @transform_4(%arg0: i32) -> (i32, i32) {
    %c0_i32 = arith.constant 0 : i32
    %c0_i32_0 = arith.constant 0 : i32
    %c0_i32_1 = arith.constant 0 : i32
    return %c0_i32, %c0_i32_0 : i32, i32
  }
  func.func @transform_5(%arg0: i32) -> (i32, i32, i32) {
    %c0_i32 = arith.constant 0 : i32
    %c0_i32_0 = arith.constant 0 : i32
    %c0_i32_1 = arith.constant 0 : i32
    %c0_i32_2 = arith.constant 0 : i32
    return %c0_i32, %c0_i32_0, %c0_i32_1 : i32, i32, i32
  }
  func.func @transform_6(%arg0: i32) -> (i32, i32) {
    %c0_i32 = arith.constant 0 : i32
    %c0_i32_0 = arith.constant 0 : i32
    %c0_i32_1 = arith.constant 0 : i32
    return %c0_i32, %c0_i32_0 : i32, i32
  }
  func.func @transform_7(%arg0: i32) -> (i32, i32, i32) {
    %c0_i32 = arith.constant 0 : i32
    %c0_i32_0 = arith.constant 0 : i32
    %c0_i32_1 = arith.constant 0 : i32
    %c0_i32_2 = arith.constant 0 : i32
    return %c0_i32, %c0_i32_0, %c0_i32_1 : i32, i32, i32
  }
  func.func @transform_8(%arg0: i32) -> (i32, i32) {
    %c0_i32 = arith.constant 0 : i32
    %c0_i32_0 = arith.constant 0 : i32
    %c0_i32_1 = arith.constant 0 : i32
    return %c0_i32, %c0_i32_0 : i32, i32
  }
  func.func @transform_9(%arg0: i32) -> (i32, i32) {
    %c0_i32 = arith.constant 0 : i32
    %c0_i32_0 = arith.constant 0 : i32
    %c0_i32_1 = arith.constant 0 : i32
    return %c0_i32, %c0_i32_0 : i32, i32
  }
  func.func @transform_10(%arg0: i32) -> (i32, i32) {
    %c0_i32 = arith.constant 0 : i32
    %c0_i32_0 = arith.constant 0 : i32
    %c0_i32_1 = arith.constant 0 : i32
    return %c0_i32, %c0_i32_0 : i32, i32
  }
  func.func @transform_11(%arg0: i32) -> (i32, i32) {
    %c0_i32 = arith.constant 0 : i32
    %c0_i32_0 = arith.constant 0 : i32
    %c0_i32_1 = arith.constant 0 : i32
    return %c0_i32, %c0_i32_0 : i32, i32
  }
  func.func @transform_12(%arg0: i32) -> (i32, i32) {
    %c0_i32 = arith.constant 0 : i32
    %c0_i32_0 = arith.constant 0 : i32
    %c0_i32_1 = arith.constant 0 : i32
    return %c0_i32, %c0_i32_0 : i32, i32
  }
  func.func @transform_13(%arg0: i32) -> (i32, i32, i32) {
    %c0_i32 = arith.constant 0 : i32
    %c0_i32_0 = arith.constant 0 : i32
    %c0_i32_1 = arith.constant 0 : i32
    return %arg0, %c0_i32, %c0_i32_0 : i32, i32, i32
  }
}

</mosaic_0001>

<bundles_post_ra>
// kernel: net_forward.1
= control target key start
LH: loop header
LB: loop body
LE: loop exit
PB: predicated region body
PF: predicated region fallthrough
CT: control target
= control target key end

     0   :  { %s7319_s0 = inlined_call_operand.vmem [shape: f32[2,32,96], index: 0, kind: input, shape index: {}]   ;;  %s7320_s1 = inlined_call_operand.vmem [shape: f32[160,32], index: 1, kind: input, shape index: {}]   ;;  %s7321_s2 = inlined_call_operand.vmem [shape: f32[10,96,84], index: 2, kind: input, shape index: {}]   ;;  %s7322_s3 = inlined_call_operand.vmem [shape: f32[1,84], index: 3, kind: input, shape index: {}]   ;;  %s7323_s4 = inlined_call_operand.vmem [shape: f32[80,16], index: 4, kind: input, shape index: {}]   ;;  %s7324_s5 = inlined_call_operand.vmem [shape: f32[10,84,80], index: 5, kind: input, shape index: {}]   ;;  %s7325_s6 = inlined_call_operand.vmem [shape: f32[1,80], index: 6, kind: input, shape index: {}]   ;;  %s7326_s7 = inlined_call_operand.vmem [shape: f32[5,80,120], index: 7, kind: input, shape index: {}]   ;;  %s7327_s8 = inlined_call_operand.vmem [shape: f32[1,120], index: 8, kind: input, shape index: {}]   ;;  %s7328_s9 = inlined_call_operand.vmem [shape: f32[120,84], index: 9, kind: input, shape index: {}]   ;;  %s7329_s10 = inlined_call_operand.vmem [shape: f32[1,84], index: 10, kind: input, shape index: {}]   ;;  %s7330_s11 = inlined_call_operand.vmem [shape: f32[84,10], index: 11, kind: input, shape index: {}]   ;;  %s7331_s12 = inlined_call_operand.vmem [shape: f32[1,10], index: 12, kind: input, shape index: {}]   ;;  %s7332_s13 = inlined_call_operand.hbm [shape: f32[2,1,10], index: 13, kind: output, shape index: {}]  }
   0x1   :  { %7334 = sst [smem:[#allocation7_spill]] %s7319_s0 }
   0x2   :  { %7335 = sst [smem:[#allocation8_spill]] %s7320_s1 }
   0x3   :  { %18 = vsyncpa [#allocation3], 0 }
   0x4   :  { %20 = vsyncpa [#allocation3 + $0x1], 0  ;;  %s5928_s25 = smov 0   ;;  %s5930_s26 = smov 0  }
   0x5   :  { %s5932_s27 = smov 0   ;;  %s5934_s28 = smov 0  }
   0x6 LB: > { %7336 = sst [smem:[#allocation5_spill]] %s5848_s27  ;;  %s5949_s29 = sadd.s32 4294967295, %s5852_s28   ;;  %s5852_s28 = sphi %s5934_s28, %s7346_s28   ;;  %s5848_s27 = sphi %s5932_s27, %s7343_s27   ;;  %s5844_s26 = sphi %s5930_s26, %s7345_s26   ;;  %s5840_s25 = sphi %s5928_s25, %s7344_s25  }
   0x7   : > { %s3567_s30 = sadd.s32 4294967294, %s5852_s28   ;;  %s5953_s14 = sadd.s32 1, %s5852_s28  }
   0x8   : > { %s311_s15 = sadd.s32 1, %s5848_s27  ;;  %s308_s16 = ssub.s32 %s5852_s28, %s5953_s14 }
   0x9   : > { %p321_p0 = scmp.ne.s32.totalorder %s5848_s27, %s5844_s26  ;;  %p309_p1 = scmp.eq.s32.totalorder %s308_s16, 0 }
   0xa   : > { %p322_p2 = scmp.eq.s32.totalorder %s5949_s29, 1  ;;  %p327_p3 = scmp.ne.s32.totalorder %s5844_s26, %s5840_s25 }
   0xb   : > { %p328_p4 = scmp.eq.s32.totalorder %s3567_s30, 1  ;;  %p3570_p7 = scmp.ge.s32.totalorder %s5852_s28, 1 }
   0xc   : > { %s5964_s17 = scalar_select %p309_p1, %s5848_s27, %s311_s15  }
   0xd   : > { %p5966_p5 = por %p322_p2, %p321_p0  ;;  %p5970_p6 = por %p328_p4, %p327_p3 }
   0xe   : > { %7337 = sst [smem:[#allocation6_spill]] %s5964_s17  ;;  %p390_p8 = scmp.lt.s32.totalorder %s5852_s28, 3 }
  0x10   : > { %p391_p9 = pnand %p3570_p7, %p390_p8 }
  0x11   : > { %p433_p10 = scmp.lt.s32.totalorder (!%p391_p9), %s5949_s29, 1  ;;  %s7340_s1 = sld [smem:[#allocation8_spill]] (!%p391_p9)  ;;  %vm462_vm0 = vcmask (!%p391_p9), 261120   ;;  %v3625_v7 = vld [vmem:[%s7321_s2 + $0x120] sm:$0xff] (!%p391_p9)  ;;  %v3626_v8 = vld [vmem:[%s7321_s2 + $0x128] sm:$0xff] (!%p391_p9)  ;;  %v3607_v12 = vld [vmem:[%s7321_s2 + $0xd0] sm:$0xff] (!%p391_p9) }
  0x12   : > { %394 = sbr.rel (%p391_p9) target bundleno = 2176 (0x880), region = 72  ;;  %s7341_s0 = sld [smem:[#allocation7_spill]] (!%p391_p9)  ;;  %v3605_v9 = vld [vmem:[%s7321_s2 + $0xc0] sm:$0xff] (!%p391_p9)  ;;  %v3606_v10 = vld [vmem:[%s7321_s2 + $0xc8] sm:$0xff] (!%p391_p9)  ;;  %v5179_v13 = vpack.c.bf16 (!%p391_p9), %v3626_v8, %v3625_v7  ;;  %v3627_v14 = vld [vmem:[%s7321_s2 + $0x130] sm:$0xff] (!%p391_p9)  ;;  %vm726_vm1 = vcmask (!%p391_p9), 785408  }
  0x13   : > { %v5131_v11 = vpack.c.bf16 (!%p391_p9), %v3606_v10, %v3605_v9  ;;  %v3608_v15 = vld [vmem:[%s7321_s2 + $0xd8] sm:$0xff] (!%p391_p9)  ;;  %v3609_v18 = vld [vmem:[%s7321_s2 + $0xe0] sm:$0xff] (!%p391_p9)  ;;  %v3610_v19 = vld [vmem:[%s7321_s2 + $0xe8] sm:$0xff] (!%p391_p9)  ;;  %vm1779_vm2 = vcmask (!%p391_p9), 130048   ;;  %vm1967_vm3 = vcmask (!%p391_p9), 1043456   ;;  %vm1960_vm4 = vcmask (!%p391_p9), 687104  }
  0x14   : > { %v3628_v16 = vld [vmem:[%s7321_s2 + $0x138] sm:$0xff] (!%p391_p9)  ;;  %v5135_v17 = vpack.c.bf16 (!%p391_p9), %v3608_v15, %v3607_v12  ;;  %v3629_v23 = vld [vmem:[%s7321_s2 + $0x140] sm:$0xff] (!%p391_p9)  ;;  %v5139_v24 = vpack.c.bf16 (!%p391_p9), %v3610_v19, %v3609_v18  ;;  %v3630_v25 = vld [vmem:[%s7321_s2 + $0x148] sm:$0xff] (!%p391_p9)  ;;  %vm5855_vm5 = vmmov (!%p391_p9), 0   ;;  %vm2903_vm6 = vcmask (!%p391_p9), 654336   ;;  %s431_s17 = sand.u32 (!%p391_p9), 1, %s5844_s26  }
  0x15   : > { %5132 = vmatprep.subr.bf16.mxu1 (!%p391_p9), %v5131_v11  ;;  %v5183_v22 = vpack.c.bf16 (!%p391_p9), %v3628_v16, %v3627_v14  ;;  %v3611_v26 = vld [vmem:[%s7321_s2 + $0xf0] sm:$0xff] (!%p391_p9)  ;;  %v3612_v27 = vld [vmem:[%s7321_s2 + $0xf8] sm:$0xff] (!%p391_p9)  ;;  %v5187_v30 = vpack.c.bf16 (!%p391_p9), %v3630_v25, %v3629_v23  ;;  %v3613_v50 = vld [vmem:[%s7321_s2 + $0x100] sm:$0xff] (!%p391_p9)  ;;  %vm3322_vm7 = vcmask (!%p391_p9), 982016   ;;  %vm3485_vm8 = vcmask (!%p391_p9), 73728   ;;  %s3930_s16 = sshll.u32 (!%p391_p9), %s5949_s29, 4 }
  0x16   : > { %5134 = vmatpush3.bf16.msra.mxu1 (!%p391_p9), %v5131_v11  ;;  %v5143_v31 = vpack.c.bf16 (!%p391_p9), %v3612_v27, %v3611_v26  ;;  %v3631_v32 = vld [vmem:[%s7321_s2 + $0x150] sm:$0xff] (!%p391_p9)  ;;  %v3632_v33 = vld [vmem:[%s7321_s2 + $0x158] sm:$0xff] (!%p391_p9)  ;;  %v3614_v51 = vld [vmem:[%s7321_s2 + $0x108] sm:$0xff] (!%p391_p9)  ;;  %s432_s20 = scalar_lea.vmem (!%p391_p9), [#allocation2], %s431_s17  ;;  %s3500_s24 = scalar_lea.sflag (!%p391_p9), [#allocation3], %s431_s17 }
  0x17   : > { %v442_v0 = vld [vmem:[%s7340_s1] sm:$0xff] (!%p391_p9)  ;;  %v443_v20 = vld [vmem:[%s7340_s1 + $0x8] sm:$0xff] (!%p391_p9)  ;;  %5136 = vmatprep.subr.bf16.mxu1 (!%p391_p9), %v5135_v17  ;;  %v444_v21 = vld [vmem:[%s7340_s1 + $0x10] sm:$0xff] (!%p391_p9)  ;;  %v5191_v36 = vpack.c.bf16 (!%p391_p9), %v3632_v33, %v3631_v32  ;;  %v5147_v53 = vpack.c.bf16 (!%p391_p9), %v3614_v51, %v3613_v50  ;;  %s3512_s21 = sshll.u32 (!%p391_p9), %s432_s20, 4  ;;  %s7278_s21 = int_to_ptr.vmem [resolvable:$true] %s3512_s21 }
  0x18   : > { %4351 = vmatprep.mubr.msk.f32.mxu0 (!%p391_p9), %vm462_vm0, %v442_v0  ;;  %v445_v28 = vld [vmem:[%s7340_s1 + $0x18] sm:$0xff] (!%p391_p9)  ;;  %v446_v29 = vld [vmem:[%s7340_s1 + $0x20] sm:$0xff] (!%p391_p9)  ;;  %v447_v34 = vld [vmem:[%s7340_s1 + $0x28] sm:$0xff] (!%p391_p9)  ;;  %s5790_s30 = scalar_lea.vmem (!%p391_p9), %s7278_s21, 16 }
  0x19   : > { %s434_s22 = scalar_select %p433_p10, %s5949_s29, 1  ;;  %v448_v35 = vld [vmem:[%s7340_s1 + $0x30] sm:$0xff]  ;;  %v449_v37 = vld [vmem:[%s7340_s1 + $0x38] sm:$0xff]  ;;  %v450_v38 = vld [vmem:[%s7340_s1 + $0x40] sm:$0xff] }
  0x1a   : > { %5138 = vmatpush3.bf16.msra.mxu1 %v5135_v17  ;;  %v451_v39 = vld [vmem:[%s7340_s1 + $0x48] sm:$0xff]  ;;  %v452_v40 = vld [vmem:[%s7340_s1 + $0x50] sm:$0xff]  ;;  %v453_v41 = vld [vmem:[%s7340_s1 + $0x58] sm:$0xff]  ;;  %p5791_p11 = scmp.ne.s32.totalorder %s7278_s21, %s5790_s30  ;;  %s5857_s29 = smov [#allocation2]  }
  0x1b   : > { %s3933_s23 = sshll.u32 %s434_s22, 5  ;;  %5140 = vmatprep.subr.bf16.mxu1 %v5139_v24  ;;  %v454_v42 = vld [vmem:[%s7340_s1 + $0x60] sm:$0xff]  ;;  %v455_v43 = vld [vmem:[%s7340_s1 + $0x68] sm:$0xff]  ;;  %v456_v44 = vld [vmem:[%s7340_s1 + $0x70] sm:$0xff] }
  0x1c   : > { %s437_s15 = scalar_lea.vmem %s7341_s0, %s3933_s23  ;;  %v457_v45 = vld [vmem:[%s7340_s1 + $0x78] sm:$0xff]  ;;  %v458_v46 = vld [vmem:[%s7340_s1 + $0x80] sm:$0xff]  ;;  %v459_v47 = vld [vmem:[%s7340_s1 + $0x88] sm:$0xff]  ;;  %s7276_s23 = scalar_lea.hbm %s7332_s13, %s3930_s16 }
  0x1d   : > { %v438_v1 = vld [vmem:[%s437_s15] sm:$0xff]  ;;  %v439_v2 = vld [vmem:[%s437_s15 + $0x8] sm:$0xff]  ;;  %v440_v3 = vld [vmem:[%s437_s15 + $0x10] sm:$0xff]  ;;  %p5792_p12 = pnand %p5791_p11, %p5966_p5 }
  0x1e   : > { %v5123_v4 = vpack.c.bf16 %v439_v2, %v438_v1  ;;  %v441_v5 = vld [vmem:[%s437_s15 + $0x18] sm:$0xff]  ;;  %5142 = vmatpush3.bf16.msra.mxu1 %v5139_v24  ;;  %v460_v48 = vld [vmem:[%s7340_s1 + $0x90] sm:$0xff]  ;;  %v3633_v52 = vld [vmem:[%s7321_s2 + $0x160] sm:$0xff]  ;;  %s5794_s15 = sshll.u32 %s5857_s29, 4  ;;  %s5795_s15 = int_to_ptr.vmem [resolvable:$false] %s5794_s15 }
  0x1f   : > { %v5127_v6 = vpack.c.bf16 %v441_v5, %v440_v3  ;;  %5144 = vmatprep.subr.bf16.mxu1 %v5143_v31  ;;  %v461_v49 = vld [vmem:[%s7340_s1 + $0x98] sm:$0xff]  ;;  %v3634_v54 = vld [vmem:[%s7321_s2 + $0x168] sm:$0xff]  ;;  %v3615_v56 = vld [vmem:[%s7321_s2 + $0x110] sm:$0xff]  ;;  %p5793_p13 = pneg %p5792_p12  ;;  %s5796_s0 = scalar_lea.vmem %s5795_s15, 32 }
  0x20   : > { %5124 = vmatprep.subr.bf16.mxu0 %v5123_v4  ;;  %v5195_v55 = vpack.c.bf16 %v3634_v54, %v3633_v52  ;;  %v3616_v57 = vld [vmem:[%s7321_s2 + $0x118] sm:$0xff]  ;;  %v3635_v58 = vld [vmem:[%s7321_s2 + $0x170] sm:$0xff]  ;;  %v688_v62 = vld [vmem:[%s7321_s2] sm:$0xff]  ;;  %p5797_p0 = scmp.lt.s32.totalorder %s7278_s21, %s5795_s15  ;;  %p5798_p1 = scmp.lt.s32.totalorder %s5796_s0, %s5790_s30 }
  0x21   : > { %5126 = vmatpush3.bf16.msra.mxu0 %v5123_v4  ;;  %v5151_v59 = vpack.c.bf16 %v3616_v57, %v3615_v56  ;;  %v3636_v60 = vld [vmem:[%s7321_s2 + $0x178] sm:$0xff]  ;;  %v689_v63 = vld [vmem:[%s7321_s2 + $0x8] sm:$0xff]  ;;  %v3593_v0 = vld [vmem:[%s7321_s2 + $0x60] sm:$0xff] }
  0x22   : > { %5128 = vmatprep.subr.bf16.mxu0 %v5127_v6  ;;  %5146 = vmatpush3.bf16.msra.mxu1 %v5143_v31  ;;  %v5199_v61 = vpack.c.bf16 %v3636_v60, %v3635_v58  ;;  %v5155_v1 = vpack.c.bf16 %v689_v63, %v688_v62  ;;  %v3594_v2 = vld [vmem:[%s7321_s2 + $0x68] sm:$0xff]  ;;  %v690_v8 = vld [vmem:[%s7321_s2 + $0x10] sm:$0xff]  ;;  %v691_v9 = vld [vmem:[%s7321_s2 + $0x18] sm:$0xff]  ;;  %p5799_p2 = por %p5798_p1, %p5797_p0 }
  0x23   : > { %5148 = vmatprep.subr.bf16.mxu1 %v5147_v53  ;;  %v5203_v3 = vpack.c.bf16 %v3594_v2, %v3593_v0  ;;  %v3595_v10 = vld [vmem:[%s7321_s2 + $0x70] sm:$0xff]  ;;  %v3596_v11 = vld [vmem:[%s7321_s2 + $0x78] sm:$0xff]  ;;  %v5159_v14 = vpack.c.bf16 %v691_v9, %v690_v8  ;;  %v692_v16 = vld [vmem:[%s7321_s2 + $0x20] sm:$0xff] }
  0x24   : > { %v5207_v15 = vpack.c.bf16 %v3596_v11, %v3595_v10  ;;  %v693_v17 = vld [vmem:[%s7321_s2 + $0x28] sm:$0xff]  ;;  %v3597_v18 = vld [vmem:[%s7321_s2 + $0x80] sm:$0xff]  ;;  %v695_v25 = vld [vmem:[%s7321_s2 + $0x38] sm:$0xff]  ;;  %p5800_p3 = pnand %p5799_p2, %p5793_p13 }
  0x25   : > { %5130 = vmatpush3.bf16.msra.mxu0 %v5127_v6  ;;  %v3598_v19 = vld [vmem:[%s7321_s2 + $0x88] sm:$0xff]  ;;  %v5163_v23 = vpack.c.bf16 %v693_v17, %v692_v16  ;;  %v3599_v26 = vld [vmem:[%s7321_s2 + $0x90] sm:$0xff]  ;;  %v3600_v27 = vld [vmem:[%s7321_s2 + $0x98] sm:$0xff] }
  0x26   : > { %5180 = vmatprep.subr.bf16.mxu0 %v5179_v13  ;;  %5150 = vmatpush3.bf16.msra.mxu1 %v5147_v53  ;;  %v5211_v24 = vpack.c.bf16 %v3598_v19, %v3597_v18  ;;  %v696_v31 = vld [vmem:[%s7321_s2 + $0x40] sm:$0xff]  ;;  %v697_v33 = vld [vmem:[%s7321_s2 + $0x48] sm:$0xff]  ;;  %v3647_v56 = vld [vmem:[%s7321_s2 + $0x190] sm:$0xff] }
  0x27   : > { %5152 = vmatprep.subr.bf16.mxu1 %v5151_v59  ;;  %v3661_v50 = vld [vmem:[%s7321_s2 + $0x1e0] sm:$0xff]  ;;  %v3662_v51 = vld [vmem:[%s7321_s2 + $0x1e8] sm:$0xff]  ;;  %v3648_v57 = vld [vmem:[%s7321_s2 + $0x198] sm:$0xff] }
  0x28   : > { %4352 = vmatmul.mubr.msk.f32.vlgmr.msra.gmra.mrb[0].mxu0 %vm462_vm0, %v443_v20  ;;  %v5251_v54 = vpack.c.bf16 %v3662_v51, %v3661_v50  ;;  %v3663_v58 = vld [vmem:[%s7321_s2 + $0x1f0] sm:$0xff]  ;;  %v5231_v62 = vpack.c.bf16 %v3648_v57, %v3647_v56  ;;  %v3649_v0 = vld [vmem:[%s7321_s2 + $0x1a0] sm:$0xff]  ;;  %v3670_v17 = vld [vmem:[%s7321_s2 + $0x228] sm:$0xff] }
  0x29   : > { %4354 = vmatprep.mubr.msk.f32.mxu0 %vm462_vm0, %v444_v21  ;;  %5182 = vmatpush3.bf16.msra.mxu0 %v5179_v13  ;;  %v3665_v2 = vld [vmem:[%s7321_s2 + $0x200] sm:$0xff]  ;;  %v3651_v10 = vld [vmem:[%s7321_s2 + $0x1b0] sm:$0xff]  ;;  %v3684_v50 = vld [vmem:[%s7321_s2 + $0x278] sm:$0xff] }
  0x2a   : > { %5184 = vmatprep.subr.bf16.mxu0 %v5183_v22  ;;  %5154 = vmatpush3.bf16.msra.mxu1 %v5151_v59  ;;  %v3664_v59 = vld [vmem:[%s7321_s2 + $0x1f8] sm:$0xff]  ;;  %v3667_v11 = vld [vmem:[%s7321_s2 + $0x210] sm:$0xff]  ;;  %v3669_v16 = vld [vmem:[%s7321_s2 + $0x220] sm:$0xff] }
  0x2b   : > { %5156 = vmatprep.subr.bf16.mxu1 %v5155_v1  ;;  %v5255_v63 = vpack.c.bf16 %v3664_v59, %v3663_v58  ;;  %v5267_v19 = vpack.c.bf16 %v3670_v17, %v3669_v16  ;;  %v3699_v51 = vld [vmem:[%s7321_s2 + $0x2d0] sm:$0xff]  ;;  %v3685_v56 = vld [vmem:[%s7321_s2 + $0x280] sm:$0xff] }
  0x2c   : > { %4355 = vmatmul.mubr.msk.f32.gmra.mrb[2].mxu0 %vm462_vm0, %v445_v28  ;;  %v3701_v57 = vld [vmem:[%s7321_s2 + $0x2e0] sm:$0xff] }
  0x2d   : > { %4357 = vmatprep.mubr.msk.f32.mxu0 %vm462_vm0, %v446_v29  ;;  %5186 = vmatpush3.bf16.msra.mxu0 %v5183_v22  ;;  %v694_v22 = vld [vmem:[%s7321_s2 + $0x30] sm:$0xff]  ;;  %v3713_v17 = vld [vmem:[%s7321_s2 + $0x320] sm:$0xff] }
  0x2e   : > { %5188 = vmatprep.subr.bf16.mxu0 %v5187_v30  ;;  %v5167_v29 = vpack.c.bf16 %v695_v25, %v694_v22  ;;  %v3671_v22 = vld [vmem:[%s7321_s2 + $0x230] sm:$0xff] }
  0x30   : > { %4358 = vmatmul.mubr.msk.f32.gmra.mrb[4].mxu0 %vm462_vm0, %v447_v34  ;;  %v3601_v34 = vld [vmem:[%s7321_s2 + $0xa0] sm:$0xff] }
  0x31   : > { %4360 = vmatprep.mubr.msk.f32.mxu0 %vm462_vm0, %v448_v35  ;;  %5190 = vmatpush3.bf16.msra.mxu0 %v5187_v30  ;;  %v5215_v30 = vpack.c.bf16 %v3600_v27, %v3599_v26  ;;  %v3602_v35 = vld [vmem:[%s7321_s2 + $0xa8] sm:$0xff]  ;;  %v3677_v26 = vld [vmem:[%s7321_s2 + $0x240] sm:$0xff] }
  0x32   : > { %5192 = vmatprep.subr.bf16.mxu0 %v5191_v36  ;;  %v3678_v27 = vld [vmem:[%s7321_s2 + $0x248] sm:$0xff] }
  0x34   : > { %4361 = vmatmul.mubr.msk.f32.gmra.mrb[6].mxu0 %vm462_vm0, %v449_v37  ;;  %v5171_v37 = vpack.c.bf16 %v697_v33, %v696_v31  ;;  %v5275_v31 = vpack.c.bf16 %v3678_v27, %v3677_v26  ;;  %v3679_v33 = vld [vmem:[%s7321_s2 + $0x250] sm:$0xff] }
  0x35   : > { %4363 = vmatprep.mubr.msk.f32.mxu0 %vm462_vm0, %v450_v38  ;;  %5194 = vmatpush3.bf16.msra.mxu0 %v5191_v36  ;;  %v5219_v38 = vpack.c.bf16 %v3602_v35, %v3601_v34  ;;  %v3680_v34 = vld [vmem:[%s7321_s2 + $0x258] sm:$0xff]  ;;  %v3695_v35 = vld [vmem:[%s7321_s2 + $0x2b0] sm:$0xff] }
  0x36   : > { %5196 = vmatprep.subr.bf16.mxu0 %v5195_v55 }
  0x38   : > { %4364 = vmatmul.mubr.msk.f32.gmra.mrb[8].mxu0 %vm462_vm0, %v451_v39  ;;  %v698_v39 = vld [vmem:[%s7321_s2 + $0x50] sm:$0xff] }
  0x39   : > { %4366 = vmatprep.mubr.msk.f32.mxu0 %vm462_vm0, %v452_v40  ;;  %5198 = vmatpush3.bf16.msra.mxu0 %v5195_v55 }
  0x3a   : > { %5200 = vmatprep.subr.bf16.mxu0 %v5199_v61 }
  0x3c   : > { %4367 = vmatmul.mubr.msk.f32.gmra.mrb[10].mxu0 %vm462_vm0, %v453_v41  ;;  %v699_v41 = vld [vmem:[%s7321_s2 + $0x58] sm:$0xff] }
  0x3d   : > { %4369 = vmatprep.mubr.msk.f32.mxu0 %vm462_vm0, %v454_v42  ;;  %5202 = vmatpush3.bf16.msra.mxu0 %v5199_v61  ;;  %v3603_v42 = vld [vmem:[%s7321_s2 + $0xb0] sm:$0xff] }
  0x3e   : > { %5204 = vmatprep.subr.bf16.mxu0 %v5203_v3 }
  0x40   : > { %4370 = vmatmul.mubr.msk.f32.gmra.mrb[12].mxu0 %vm462_vm0, %v455_v43  ;;  %v3604_v43 = vld [vmem:[%s7321_s2 + $0xb8] sm:$0xff] }
  0x41   : > { %4372 = vmatprep.mubr.msk.f32.mxu0 %vm462_vm0, %v456_v44 }
  0x44   : > { %4373 = vmatmul.mubr.msk.f32.gmra.mrb[14].mxu0 %vm462_vm0, %v457_v45  ;;  %v5175_v45 = vpack.c.bf16 %v699_v41, %v698_v39  ;;  %v3681_v41 = vld [vmem:[%s7321_s2 + $0x260] sm:$0xff] }
  0x45   : > { %4375 = vmatprep.mubr.msk.f32.mxu0 %vm462_vm0, %v458_v46  ;;  %v5223_v46 = vpack.c.bf16 %v3604_v43, %v3603_v42  ;;  %v3682_v42 = vld [vmem:[%s7321_s2 + $0x268] sm:$0xff]  ;;  %v3697_v43 = vld [vmem:[%s7321_s2 + $0x2c0] sm:$0xff] }
  0x48   : > { %4376 = vmatmul.mubr.msk.f32.gmra.mrb[16].mxu0 %vm462_vm0, %v459_v47  ;;  %v3645_v47 = vld [vmem:[%s7321_s2 + $0x180] sm:$0xff] }
  0x49   : > { %4378 = vmatprep.mubr.msk.f32.mxu0 %vm462_vm0, %v460_v48 }
  0x4c   : > { %4379 = vmatmul.mubr.msk.f32.gmra.mrb[18].mxu0 %vm462_vm0, %v461_v49  ;;  %v3646_v49 = vld [vmem:[%s7321_s2 + $0x188] sm:$0xff] }
  0x4d   : > { %v5227_v53 = vpack.c.bf16 %v3646_v49, %v3645_v47  ;;  %v3683_v49 = vld [vmem:[%s7321_s2 + $0x270] sm:$0xff] }
  0xfb   : > { %v6145_v4 = vpop.f32.mrb[0].mxu0 }
  0xfc   : > { %v589_v5 = vpop.f32.mrb[1].mxu0 }
  0xff   : > { %v6147_v6 = vpop.f32.mrb[2].mxu0 }
 0x100   : > { %v6149_v7 = vpop.f32.mrb[3].mxu0 }
 0x103   : > { %v4359_v12 = vpop.f32.mrb[4].mxu0 }
 0x104   : > { %v609_v13 = vpop.f32.mrb[5].mxu0 }
 0x105   : > { %4405 = vmatprep.mubr.msk.f32.mxu1 %vm726_vm1, %v609_v13  ;;  %4465 = vmatprep.mubr.msk.f32.mxu0 %vm726_vm1, %v609_v13 }
 0x106   : > { %4406 = vmatmul.mubr.msk.f32.vlgmr.msra.gmra.mrb[0].mxu1 %vm726_vm1, %v4359_v12  ;;  %4466 = vmatmul.mubr.msk.f32.vlgmr.msra.gmra.mrb[20].mxu0 %vm726_vm1, %v4359_v12  ;;  %v3668_v12 = vld [vmem:[%s7321_s2 + $0x218] sm:$0xff] }
 0x107   : > { %5158 = vmatpush3.bf16.msra.mxu1 %v5155_v1  ;;  %5206 = vmatpush3.bf16.msra.mxu0 %v5203_v3  ;;  %v4362_v20 = vpop.f32.mrb[6].mxu0  ;;  %v3650_v1 = vld [vmem:[%s7321_s2 + $0x1a8] sm:$0xff]  ;;  %v5263_v13 = vpack.c.bf16 %v3668_v12, %v3667_v11  ;;  %v3711_v12 = vld [vmem:[%s7321_s2 + $0x310] sm:$0xff] }
 0x108   : > { %v619_v21 = vpop.f32.mrb[7].mxu0  ;;  %5160 = vmatprep.subr.bf16.mxu1 %v5159_v14  ;;  %5208 = vmatprep.subr.bf16.mxu0 %v5207_v15  ;;  %v3666_v3 = vld [vmem:[%s7321_s2 + $0x208] sm:$0xff]  ;;  %v5235_v8 = vpack.c.bf16 %v3650_v1, %v3649_v0  ;;  %v3703_v0 = vld [vmem:[%s7321_s2 + $0x2f0] sm:$0xff] }
 0x109   : > { %4408 = vmatprep.mubr.msk.f32.mxu1 %vm726_vm1, %v619_v21  ;;  %4468 = vmatprep.mubr.msk.f32.mxu0 %vm726_vm1, %v619_v21  ;;  %v5259_v9 = vpack.c.bf16 %v3666_v3, %v3665_v2  ;;  %v3656_v21 = vld [vmem:[%s7321_s2 + $0x1d8] sm:$0xff]  ;;  %v3709_v3 = vld [vmem:[%s7321_s2 + $0x300] sm:$0xff] }
 0x10a   : > { %4409 = vmatmul.mubr.msk.f32.gmra.mrb[2].mxu1 %vm726_vm1, %v4362_v20  ;;  %4469 = vmatmul.mubr.msk.f32.gmra.mrb[22].mxu0 %vm726_vm1, %v4362_v20  ;;  %v3655_v20 = vld [vmem:[%s7321_s2 + $0x1d0] sm:$0xff] }
 0x10b   : > { %5162 = vmatpush3.bf16.msra.mxu1 %v5159_v14  ;;  %5210 = vmatpush3.bf16.msra.mxu0 %v5207_v15  ;;  %v6195_v28 = vpop.f32.mrb[8].mxu0  ;;  %v3653_v14 = vld [vmem:[%s7321_s2 + $0x1c0] sm:$0xff]  ;;  %v3654_v15 = vld [vmem:[%s7321_s2 + $0x1c8] sm:$0xff] }
 0x10c   : > { %4435 = vmatprep.mubr.msk.f32.mxu1 %vm726_vm1, %v589_v5  ;;  %4495 = vmatprep.mubr.msk.f32.mxu0 %vm726_vm1, %v589_v5  ;;  %v6202_v32 = vpop.f32.mrb[9].mxu0  ;;  %v5243_v18 = vpack.c.bf16 %v3654_v15, %v3653_v14  ;;  %v3728_v14 = vld [vmem:[%s7321_s2 + $0x378] sm:$0xff] }
 0x10d   : > { %5164 = vmatprep.subr.bf16.mxu1 %v5163_v23  ;;  %5212 = vmatprep.subr.bf16.mxu0 %v5211_v24 }
 0x10f   : > { %5166 = vmatpush3.bf16.msra.mxu1 %v5163_v23  ;;  %5214 = vmatpush3.bf16.msra.mxu0 %v5211_v24  ;;  %v6213_v36 = vpop.f32.mrb[10].mxu0  ;;  %v3672_v23 = vld [vmem:[%s7321_s2 + $0x238] sm:$0xff]  ;;  %v5247_v24 = vpack.c.bf16 %v3656_v21, %v3655_v20  ;;  %v3730_v20 = vld [vmem:[%s7321_s2 + $0x388] sm:$0xff] }
 0x110   : > { %5168 = vmatprep.subr.bf16.mxu1 %v5167_v29  ;;  %5216 = vmatprep.subr.bf16.mxu0 %v5215_v30  ;;  %v6218_v40 = vpop.f32.mrb[11].mxu0  ;;  %v5271_v25 = vpack.c.bf16 %v3672_v23, %v3671_v22  ;;  %v3715_v23 = vld [vmem:[%s7321_s2 + $0x330] sm:$0xff] }
 0x113   : > { %5170 = vmatpush3.bf16.msra.mxu1 %v5167_v29  ;;  %5218 = vmatpush3.bf16.msra.mxu0 %v5215_v30  ;;  %v6229_v44 = vpop.f32.mrb[12].mxu0  ;;  %v3693_v29 = vld [vmem:[%s7321_s2 + $0x2a0] sm:$0xff]  ;;  %v3694_v30 = vld [vmem:[%s7321_s2 + $0x2a8] sm:$0xff] }
 0x114   : > { %5172 = vmatprep.subr.bf16.mxu1 %v5171_v37  ;;  %5220 = vmatprep.subr.bf16.mxu0 %v5219_v38  ;;  %v6234_v48 = vpop.f32.mrb[13].mxu0 }
 0x117   : > { %5174 = vmatpush3.bf16.msra.mxu1 %v5171_v37  ;;  %5222 = vmatpush3.bf16.msra.mxu0 %v5219_v38  ;;  %v6245_v52 = vpop.f32.mrb[14].mxu0  ;;  %v3696_v37 = vld [vmem:[%s7321_s2 + $0x2b8] sm:$0xff]  ;;  %v5279_v38 = vpack.c.bf16 %v3680_v34, %v3679_v33  ;;  %v3719_v33 = vld [vmem:[%s7321_s2 + $0x350] sm:$0xff] }
 0x118   : > { %5176 = vmatprep.subr.bf16.mxu1 %v5175_v45  ;;  %5224 = vmatprep.subr.bf16.mxu0 %v5223_v46  ;;  %v6247_v55 = vpop.f32.mrb[15].mxu0  ;;  %v5303_v39 = vpack.c.bf16 %v3696_v37, %v3695_v35  ;;  %v3720_v34 = vld [vmem:[%s7321_s2 + $0x358] sm:$0xff]  ;;  %v3735_v35 = vld [vmem:[%s7321_s2 + $0x3b0] sm:$0xff] }
 0x119   : > { %v5343_v37 = vpack.c.bf16 %v3720_v34, %v3719_v33  ;;  %v1778_v34 = vld [vmem:[%s7323_s4 + $0x48] sm:$0xff] }
 0x11b   : > { %5178 = vmatpush3.bf16.msra.mxu1 %v5175_v45  ;;  %5226 = vmatpush3.bf16.msra.mxu0 %v5223_v46  ;;  %v6261_v60 = vpop.f32.mrb[16].mxu0  ;;  %v3698_v45 = vld [vmem:[%s7321_s2 + $0x2c8] sm:$0xff]  ;;  %v5283_v46 = vpack.c.bf16 %v3682_v42, %v3681_v41  ;;  %v3783_v42 = vld [vmem:[%s7324_s5 + $0x120] sm:$0xff] }
 0x11c   : > { %5228 = vmatprep.subr.bf16.mxu1 %v5227_v53  ;;  %5252 = vmatprep.subr.bf16.mxu0 %v5251_v54  ;;  %v6263_v61 = vpop.f32.mrb[17].mxu0  ;;  %v5307_v47 = vpack.c.bf16 %v3698_v45, %v3697_v43  ;;  %v3784_v45 = vld [vmem:[%s7324_s5 + $0x128] sm:$0xff] }
 0x11e   : > { %4436 = vmatmul.mubr.msk.f32.vlgmr.msra.gmra.mrb[0].mxu1 %vm726_vm1, %v6145_v4  ;;  %4496 = vmatmul.mubr.msk.f32.vlgmr.msra.gmra.mrb[20].mxu0 %vm726_vm1, %v6145_v4 }
 0x11f   : > { %4438 = vmatprep.mubr.msk.f32.mxu1 %vm726_vm1, %v6149_v7  ;;  %4498 = vmatprep.mubr.msk.f32.mxu0 %vm726_vm1, %v6149_v7  ;;  %v6285_v5 = vpop.f32.mrb[18].mxu0  ;;  %v3652_v7 = vld [vmem:[%s7321_s2 + $0x1b8] sm:$0xff] }
 0x120   : > { %5230 = vmatpush3.bf16.msra.mxu1 %v5227_v53  ;;  %5254 = vmatpush3.bf16.msra.mxu0 %v5251_v54  ;;  %v6287_v4 = vpop.f32.mrb[19].mxu0  ;;  %v5287_v53 = vpack.c.bf16 %v3684_v50, %v3683_v49  ;;  %v3786_v49 = vld [vmem:[%s7324_s5 + $0x138] sm:$0xff]  ;;  %v3787_v50 = vld [vmem:[%s7324_s5 + $0x140] sm:$0xff] }
 0x121   : > { %5232 = vmatprep.subr.bf16.mxu1 %v5231_v62  ;;  %5256 = vmatprep.subr.bf16.mxu0 %v5255_v63 }
 0x122   : > { %4439 = vmatmul.mubr.msk.f32.gmra.mrb[2].mxu1 %vm726_vm1, %v6147_v6  ;;  %4499 = vmatmul.mubr.msk.f32.gmra.mrb[22].mxu0 %vm726_vm1, %v6147_v6  ;;  %v5239_v6 = vpack.c.bf16 %v3652_v7, %v3651_v10  ;;  %v3726_v10 = vld [vmem:[%s7321_s2 + $0x368] sm:$0xff] }
 0x123   : > { %4525 = vmatprep.mubr.msk.f32.mxu1 %vm726_vm1, %v6202_v32  ;;  %4555 = vmatprep.mubr.msk.f32.mxu0 %vm726_vm1, %v6202_v32  ;;  %v5299_v32 = vpack.c.bf16 %v3694_v30, %v3693_v29  ;;  %v3717_v29 = vld [vmem:[%s7321_s2 + $0x340] sm:$0xff] }
 0x124   : > { %5234 = vmatpush3.bf16.msra.mxu1 %v5231_v62  ;;  %5258 = vmatpush3.bf16.msra.mxu0 %v5255_v63  ;;  %v3687_v62 = vld [vmem:[%s7321_s2 + $0x290] sm:$0xff]  ;;  %v3688_v63 = vld [vmem:[%s7321_s2 + $0x298] sm:$0xff]  ;;  %v3733_v30 = vld [vmem:[%s7321_s2 + $0x3a0] sm:$0xff] }
 0x125   : > { %5236 = vmatprep.subr.bf16.mxu1 %v5235_v8  ;;  %5260 = vmatprep.subr.bf16.mxu0 %v5259_v9  ;;  %v5295_v1 = vpack.c.bf16 %v3688_v63, %v3687_v62 }
 0x128   : > { %5238 = vmatpush3.bf16.msra.mxu1 %v5235_v8  ;;  %5262 = vmatpush3.bf16.msra.mxu0 %v5259_v9  ;;  %v3710_v8 = vld [vmem:[%s7321_s2 + $0x308] sm:$0xff]  ;;  %v3725_v9 = vld [vmem:[%s7321_s2 + $0x360] sm:$0xff] }
 0x129   : > { %5240 = vmatprep.subr.bf16.mxu1 %v5239_v6  ;;  %5264 = vmatprep.subr.bf16.mxu0 %v5263_v13  ;;  %v5323_v7 = vpack.c.bf16 %v3710_v8, %v3709_v3  ;;  %v5347_v11 = vpack.c.bf16 %v3726_v10, %v3725_v9 }
 0x12c   : > { %5242 = vmatpush3.bf16.msra.mxu1 %v5239_v6  ;;  %5266 = vmatpush3.bf16.msra.mxu0 %v5263_v13  ;;  %v3712_v6 = vld [vmem:[%s7321_s2 + $0x318] sm:$0xff]  ;;  %v3727_v13 = vld [vmem:[%s7321_s2 + $0x370] sm:$0xff] }
 0x12d   : > { %5244 = vmatprep.subr.bf16.mxu1 %v5243_v18  ;;  %5268 = vmatprep.subr.bf16.mxu0 %v5267_v19  ;;  %v5327_v15 = vpack.c.bf16 %v3712_v6, %v3711_v12  ;;  %v5351_v16 = vpack.c.bf16 %v3728_v14, %v3727_v13  ;;  %v3764_v12 = vld [vmem:[%s7324_s5 + $0xb8] sm:$0xff] }
 0x130   : > { %5246 = vmatpush3.bf16.msra.mxu1 %v5243_v18  ;;  %5270 = vmatpush3.bf16.msra.mxu0 %v5267_v19  ;;  %v3714_v18 = vld [vmem:[%s7321_s2 + $0x328] sm:$0xff]  ;;  %v3729_v19 = vld [vmem:[%s7321_s2 + $0x380] sm:$0xff] }
 0x131   : > { %5248 = vmatprep.subr.bf16.mxu1 %v5247_v24  ;;  %5272 = vmatprep.subr.bf16.mxu0 %v5271_v25  ;;  %v5331_v21 = vpack.c.bf16 %v3714_v18, %v3713_v17  ;;  %v5355_v22 = vpack.c.bf16 %v3730_v20, %v3729_v19  ;;  %v3766_v17 = vld [vmem:[%s7324_s5 + $0xc8] sm:$0xff]  ;;  %v1771_v19 = vld [vmem:[%s7323_s4 + $0x10] sm:$0xff] }
 0x132   : > { %v1770_v18 = vld [vmem:[%s7323_s4 + $0x8] sm:$0xff] }
 0x134   : > { %5250 = vmatpush3.bf16.msra.mxu1 %v5247_v24  ;;  %5274 = vmatpush3.bf16.msra.mxu0 %v5271_v25  ;;  %v3716_v24 = vld [vmem:[%s7321_s2 + $0x338] sm:$0xff]  ;;  %v3731_v25 = vld [vmem:[%s7321_s2 + $0x390] sm:$0xff] }
 0x135   : > { %5276 = vmatprep.subr.bf16.mxu1 %v5275_v31  ;;  %5300 = vmatprep.subr.bf16.mxu0 %v5299_v32  ;;  %v5335_v26 = vpack.c.bf16 %v3716_v24, %v3715_v23  ;;  %v1772_v23 = vld [vmem:[%s7323_s4 + $0x18] sm:$0xff]  ;;  %v1773_v24 = vld [vmem:[%s7323_s4 + $0x20] sm:$0xff] }
 0x137   : > { %4526 = vmatmul.mubr.msk.f32.vlgmr.msra.gmra.mrb[0].mxu1 %vm726_vm1, %v6195_v28  ;;  %4556 = vmatmul.mubr.msk.f32.vlgmr.msra.gmra.mrb[20].mxu0 %vm726_vm1, %v6195_v28  ;;  %v3700_v28 = vld [vmem:[%s7321_s2 + $0x2d8] sm:$0xff] }
 0x138   : > { %5278 = vmatpush3.bf16.msra.mxu1 %v5275_v31  ;;  %5302 = vmatpush3.bf16.msra.mxu0 %v5299_v32  ;;  %v5311_v54 = vpack.c.bf16 %v3700_v28, %v3699_v51  ;;  %v5427_v51 = vpack.c.bf16 %v3787_v50, %v3786_v49  ;;  %v3788_v28 = vld [vmem:[%s7324_s5 + $0x148] sm:$0xff] }
 0x139   : > { %5280 = vmatprep.subr.bf16.mxu1 %v5279_v38  ;;  %5304 = vmatprep.subr.bf16.mxu0 %v5303_v39 }
 0x13a   : > { %4528 = vmatprep.mubr.msk.f32.mxu1 %vm726_vm1, %v6218_v40  ;;  %4558 = vmatprep.mubr.msk.f32.mxu0 %vm726_vm1, %v6218_v40  ;;  %v3686_v40 = vld [vmem:[%s7321_s2 + $0x288] sm:$0xff] }
 0x13b   : > { %4529 = vmatmul.mubr.msk.f32.gmra.mrb[2].mxu1 %vm726_vm1, %v6213_v36  ;;  %4559 = vmatmul.mubr.msk.f32.gmra.mrb[22].mxu0 %vm726_vm1, %v6213_v36  ;;  %v3702_v36 = vld [vmem:[%s7321_s2 + $0x2e8] sm:$0xff]  ;;  %v5291_v58 = vpack.c.bf16 %v3686_v40, %v3685_v56 }
 0x13c   : > { %5282 = vmatpush3.bf16.msra.mxu1 %v5279_v38  ;;  %5306 = vmatpush3.bf16.msra.mxu0 %v5303_v39  ;;  %v5315_v59 = vpack.c.bf16 %v3702_v36, %v3701_v57  ;;  %v1769_v39 = vld [vmem:[%s7323_s4] sm:$0xff] }
 0x13d   : > { %5284 = vmatprep.subr.bf16.mxu1 %v5283_v46  ;;  %5308 = vmatprep.subr.bf16.mxu0 %v5307_v47 }
 0x13e   : > { %4585 = vmatprep.mubr.msk.f32.mxu1 %vm726_vm1, %v6234_v48  ;;  %4615 = vmatprep.mubr.msk.f32.mxu0 %vm726_vm1, %v6234_v48  ;;  %v3704_v48 = vld [vmem:[%s7321_s2 + $0x2f8] sm:$0xff] }
 0x13f   : > { %v5319_v2 = vpack.c.bf16 %v3704_v48, %v3703_v0 }
 0x140   : > { %5286 = vmatpush3.bf16.msra.mxu1 %v5283_v46  ;;  %5310 = vmatpush3.bf16.msra.mxu0 %v5307_v47  ;;  %v3785_v46 = vld [vmem:[%s7324_s5 + $0x130] sm:$0xff] }
 0x141   : > { %5288 = vmatprep.subr.bf16.mxu1 %v5287_v53  ;;  %5312 = vmatprep.subr.bf16.mxu0 %v5311_v54  ;;  %v5423_v47 = vpack.c.bf16 %v3785_v46, %v3784_v45  ;;  %v1928_v45 = vld [vmem:[%s7324_s5 + $0x18] sm:$0xff]  ;;  %v3754_v46 = vld [vmem:[%s7324_s5 + $0x68] sm:$0xff] }
 0x144   : > { %5290 = vmatpush3.bf16.msra.mxu1 %v5287_v53  ;;  %5314 = vmatpush3.bf16.msra.mxu0 %v5311_v54  ;;  %v3789_v53 = vld [vmem:[%s7324_s5 + $0x150] sm:$0xff] }
 0x145   : > { %5292 = vmatprep.subr.bf16.mxu1 %v5291_v58  ;;  %5316 = vmatprep.subr.bf16.mxu0 %v5315_v59  ;;  %v5431_v54 = vpack.c.bf16 %v3789_v53, %v3788_v28 }
 0x148   : > { %5294 = vmatpush3.bf16.msra.mxu1 %v5291_v58  ;;  %5318 = vmatpush3.bf16.msra.mxu0 %v5315_v59 }
 0x149   : > { %5296 = vmatprep.subr.bf16.mxu1 %v5295_v1  ;;  %5320 = vmatprep.subr.bf16.mxu0 %v5319_v2 }
 0x14c   : > { %5298 = vmatpush3.bf16.msra.mxu1 %v5295_v1  ;;  %5322 = vmatpush3.bf16.msra.mxu0 %v5319_v2  ;;  %v3741_v1 = vld [vmem:[%s7322_s3] ss:$0 sm:$0xff] }
 0x14d   : > { %5324 = vmatprep.subr.bf16.mxu1 %v5323_v7  ;;  %5348 = vmatprep.subr.bf16.mxu0 %v5347_v11 }
 0x14f   : > { %4586 = vmatmul.mubr.msk.f32.vlgmr.msra.gmra.mrb[0].mxu1 %vm726_vm1, %v6229_v44  ;;  %4616 = vmatmul.mubr.msk.f32.vlgmr.msra.gmra.mrb[20].mxu0 %vm726_vm1, %v6229_v44  ;;  %v3732_v44 = vld [vmem:[%s7321_s2 + $0x398] sm:$0xff] }
 0x150   : > { %5326 = vmatpush3.bf16.msra.mxu1 %v5323_v7  ;;  %5350 = vmatpush3.bf16.msra.mxu0 %v5347_v11  ;;  %v5359_v27 = vpack.c.bf16 %v3732_v44, %v3731_v25  ;;  %v3763_v11 = vld [vmem:[%s7324_s5 + $0xb0] sm:$0xff]  ;;  %v3769_v44 = vld [vmem:[%s7324_s5 + $0xe0] sm:$0xff] }
 0x151   : > { %5328 = vmatprep.subr.bf16.mxu1 %v5327_v15  ;;  %5352 = vmatprep.subr.bf16.mxu0 %v5351_v16 }
 0x152   : > { %4588 = vmatprep.mubr.msk.f32.mxu1 %vm726_vm1, %v6247_v55  ;;  %4618 = vmatprep.mubr.msk.f32.mxu0 %vm726_vm1, %v6247_v55  ;;  %v3718_v55 = vld [vmem:[%s7321_s2 + $0x348] sm:$0xff] }
 0x153   : > { %4589 = vmatmul.mubr.msk.f32.gmra.mrb[2].mxu1 %vm726_vm1, %v6245_v52  ;;  %4619 = vmatmul.mubr.msk.f32.gmra.mrb[22].mxu0 %vm726_vm1, %v6245_v52  ;;  %v3734_v52 = vld [vmem:[%s7321_s2 + $0x3a8] sm:$0xff]  ;;  %v5339_v31 = vpack.c.bf16 %v3718_v55, %v3717_v29  ;;  %v1775_v29 = vld [vmem:[%s7323_s4 + $0x30] sm:$0xff] }
 0x154   : > { %5330 = vmatpush3.bf16.msra.mxu1 %v5327_v15  ;;  %5354 = vmatpush3.bf16.msra.mxu0 %v5351_v16  ;;  %v5363_v32 = vpack.c.bf16 %v3734_v52, %v3733_v30  ;;  %v5375_v15 = vpack.c.bf16 %v3764_v12, %v3763_v11  ;;  %v3765_v16 = vld [vmem:[%s7324_s5 + $0xc0] sm:$0xff]  ;;  %v3771_v30 = vld [vmem:[%s7324_s5 + $0xf0] sm:$0xff]  ;;  %v3772_v52 = vld [vmem:[%s7324_s5 + $0xf8] sm:$0xff] }
 0x155   : > { %5332 = vmatprep.subr.bf16.mxu1 %v5331_v21  ;;  %5356 = vmatprep.subr.bf16.mxu0 %v5355_v22  ;;  %v5379_v20 = vpack.c.bf16 %v3766_v17, %v3765_v16  ;;  %v5391_v33 = vpack.c.bf16 %v3772_v52, %v3771_v30  ;;  %v3761_v11 = vld [vmem:[%s7324_s5 + $0xa0] sm:$0xff]  ;;  %v3762_v16 = vld [vmem:[%s7324_s5 + $0xa8] sm:$0xf]  ;;  %v3815_v30 = vld [vmem:[%s7324_s5 + $0x1d8] sm:$0xff] }
 0x156   : > { %4645 = vmatprep.mubr.msk.f32.mxu1 %vm726_vm1, %v6263_v61  ;;  %4675 = vmatprep.mubr.msk.f32.mxu0 %vm726_vm1, %v6263_v61  ;;  %v3736_v61 = vld [vmem:[%s7321_s2 + $0x3b8] sm:$0xff]  ;;  %v3797_v17 = vld [vmem:[%s7324_s5 + $0x160] sm:$0xff] }
 0x157   : > { %v5367_v38 = vpack.c.bf16 %v3736_v61, %v3735_v35  ;;  %v3773_v35 = vld [vmem:[%s7324_s5 + $0x100] sm:$0xf]  ;;  %v3790_v61 = vld [vmem:[%s7324_s5 + $0x158] sm:$0xf] }
 0x158   : > { %5334 = vmatpush3.bf16.msra.mxu1 %v5331_v21  ;;  %5358 = vmatpush3.bf16.msra.mxu0 %v5355_v22  ;;  %v3767_v21 = vld [vmem:[%s7324_s5 + $0xd0] sm:$0xff]  ;;  %v3768_v22 = vld [vmem:[%s7324_s5 + $0xd8] sm:$0xff]  ;;  %v3816_v52 = vld [vmem:[%s7324_s5 + $0x1e0] sm:$0xff] }
 0x159   : > { %5336 = vmatprep.subr.bf16.mxu1 %v5335_v26  ;;  %5360 = vmatprep.subr.bf16.mxu0 %v5359_v27  ;;  %v5383_v25 = vpack.c.bf16 %v3768_v22, %v3767_v21  ;;  %v3799_v21 = vld [vmem:[%s7324_s5 + $0x170] sm:$0xff]  ;;  %v3800_v22 = vld [vmem:[%s7324_s5 + $0x178] sm:$0xff] }
 0x15c   : > { %5338 = vmatpush3.bf16.msra.mxu1 %v5335_v26  ;;  %5362 = vmatpush3.bf16.msra.mxu0 %v5359_v27  ;;  %v3770_v26 = vld [vmem:[%s7324_s5 + $0xe8] sm:$0xff] }
 0x15d   : > { %5340 = vmatprep.subr.bf16.mxu1 %v5339_v31  ;;  %5364 = vmatprep.subr.bf16.mxu0 %v5363_v32  ;;  %v1774_v27 = vld [vmem:[%s7323_s4 + $0x28] sm:$0xff]  ;;  %v5387_v55 = vpack.c.bf16 %v3770_v26, %v3769_v44  ;;  %v5459_v26 = vpack.c.bf16 %v3800_v22, %v3799_v21  ;;  %v3867_v22 = vld [vmem:[%s7324_s5 + $0x318] sm:$0xff] }
 0x15e   : > { %v3854_v21 = vld [vmem:[%s7324_s5 + $0x2c8] sm:$0xff] }
 0x160   : > { %5342 = vmatpush3.bf16.msra.mxu1 %v5339_v31  ;;  %5366 = vmatpush3.bf16.msra.mxu0 %v5363_v32  ;;  %v1776_v31 = vld [vmem:[%s7323_s4 + $0x38] sm:$0xff]  ;;  %v1777_v32 = vld [vmem:[%s7323_s4 + $0x40] sm:$0xff] }
 0x161   : > { %5344 = vmatprep.subr.bf16.mxu1 %v5343_v37  ;;  %5368 = vmatprep.subr.bf16.mxu0 %v5367_v38 }
 0x164   : > { %5346 = vmatpush3.bf16.msra.mxu1 %v5343_v37  ;;  %5370 = vmatpush3.bf16.msra.mxu0 %v5367_v38  ;;  %v1925_v37 = vld [vmem:[%s7324_s5] sm:$0xff]  ;;  %v1926_v38 = vld [vmem:[%s7324_s5 + $0x8] sm:$0xff] }
 0x167   : > { %4646 = vmatmul.mubr.msk.f32.vlgmr.msra.gmra.mrb[0].mxu1 %vm726_vm1, %v6261_v60  ;;  %4676 = vmatmul.mubr.msk.f32.vlgmr.msra.gmra.mrb[20].mxu0 %vm726_vm1, %v6261_v60  ;;  %v3780_v60 = vld [vmem:[%s7324_s5 + $0x108] sm:$0xff] }
 0x168   : > { %4648 = vmatprep.mubr.msk.f32.mxu1 %vm726_vm1, %v6287_v4  ;;  %4678 = vmatprep.mubr.msk.f32.mxu0 %vm726_vm1, %v6287_v4  ;;  %v3781_v4 = vld [vmem:[%s7324_s5 + $0x110] sm:$0xff] }
 0x169   : > { %v5415_v41 = vpack.c.bf16 %v3781_v4, %v3780_v60  ;;  %v3753_v60 = vld [vmem:[%s7324_s5 + $0x60] sm:$0xff]  ;;  %v5395_v4 = vpack.c.bf16 %v1926_v38, %v1925_v37 }
 0x16b   : > { %4649 = vmatmul.mubr.msk.f32.gmra.mrb[2].mxu1 %vm726_vm1, %v6285_v5  ;;  %4679 = vmatmul.mubr.msk.f32.gmra.mrb[22].mxu0 %vm726_vm1, %v6285_v5  ;;  %v3782_v5 = vld [vmem:[%s7324_s5 + $0x118] sm:$0xff] }
 0x16c   : > { %4685 = vmatprep.mubr.msk.f32.mxu1 %vm1779_vm2, %v1769_v39  ;;  %v5419_v43 = vpack.c.bf16 %v3783_v42, %v3782_v5  ;;  %5416 = vmatprep.subr.bf16.mxu0 %v5415_v41  ;;  %v3752_v39 = vld [vmem:[%s7324_s5 + $0x58] sm:$0xff] }
 0x16d   : > { %5418 = vmatpush3.bf16.msra.mxu0 %v5415_v41  ;;  %v5435_v41 = vpack.c.bf16 %v3753_v60, %v3752_v39  ;;  %v3805_v39 = vld [vmem:[%s7324_s5 + $0x1a0] sm:$0xff]  ;;  %v3806_v60 = vld [vmem:[%s7324_s5 + $0x1a8] sm:$0xff] }
 0x16e   : > { %5420 = vmatprep.subr.bf16.mxu0 %v5419_v43 }
 0x171   : > { %5422 = vmatpush3.bf16.msra.mxu0 %v5419_v43  ;;  %v1927_v43 = vld [vmem:[%s7324_s5 + $0x10] sm:$0xff] }
 0x172   : > { %5424 = vmatprep.subr.bf16.mxu0 %v5423_v47  ;;  %v5399_v28 = vpack.c.bf16 %v1928_v45, %v1927_v43  ;;  %v3807_v43 = vld [vmem:[%s7324_s5 + $0x1b0] sm:$0xf]  ;;  %v3821_v45 = vld [vmem:[%s7324_s5 + $0x208] sm:$0xf] }
 0x175   : > { %5426 = vmatpush3.bf16.msra.mxu0 %v5423_v47  ;;  %v3755_v47 = vld [vmem:[%s7324_s5 + $0x70] sm:$0xff] }
 0x176   : > { %5428 = vmatprep.subr.bf16.mxu0 %v5427_v51  ;;  %v5439_v53 = vpack.c.bf16 %v3755_v47, %v3754_v46  ;;  %v3825_v46 = vld [vmem:[%s7324_s5 + $0x210] sm:$0xff]  ;;  %v3826_v47 = vld [vmem:[%s7324_s5 + $0x218] sm:$0xff] }
 0x179   : > { %5430 = vmatpush3.bf16.msra.mxu0 %v5427_v51  ;;  %v1929_v51 = vld [vmem:[%s7324_s5 + $0x20] sm:$0xff] }
 0x17a   : > { %5432 = vmatprep.subr.bf16.mxu0 %v5431_v54 }
 0x17d   : > { %5434 = vmatpush3.bf16.msra.mxu0 %v5431_v54  ;;  %v1930_v54 = vld [vmem:[%s7324_s5 + $0x28] sm:$0xff] }
 0x17e   : > { %4770 = vmatprep.subr.msk.mxu0 %vm1967_vm3, %v3790_v61 }
 0x181   : > { %4771 = vmatpush3.msk.msra.mxu0 %vm1967_vm3, %v3790_v61  ;;  %v3818_v61 = vld [vmem:[%s7324_s5 + $0x1f0] sm:$0xff] }
 0x182   : > { %5436 = vmatprep.subr.bf16.mxu0 %v5435_v41 }
 0x23a   : > { %v4647_v56 = vpop.f32.mrb[0].mxu1  ;;  %v4677_v40 = vpop.f32.mrb[20].mxu0 }
 0x23b   : > { %v1627_v57 = vpop.f32.mrb[1].mxu1  ;;  %v1729_v36 = vpop.f32.mrb[21].mxu0 }
 0x23e   : > { %v4650_v58 = vpop.f32.mrb[2].mxu1  ;;  %v4680_v59 = vpop.f32.mrb[22].mxu0 }
 0x23f   : > { %v1753_v62 = vmax.f32 %v4647_v56, %v4650_v58  ;;  %v1755_v63 = vmax.f32 %v4677_v40, %v4680_v59  ;;  %v1637_v0 = vpop.f32.mrb[3].mxu1  ;;  %v1739_v48 = vpop.f32.mrb[23].mxu0  ;;  %v3756_v56 = vld [vmem:[%s7324_s5 + $0x78] sm:$0xff]  ;;  %v3757_v40 = vld [vmem:[%s7324_s5 + $0x80] sm:$0xff]  ;;  %v1931_v59 = vld [vmem:[%s7324_s5 + $0x30] sm:$0xff] }
 0x240   : > { %v1752_v2 = vmax.f32 %v1627_v57, %v1637_v0  ;;  %v1754_v3 = vmax.f32 %v1729_v36, %v1739_v48  ;;  %v5403_v36 = vpack.c.bf16 %v1930_v54, %v1929_v51  ;;  %v5443_v58 = vpack.c.bf16 %v3757_v40, %v3756_v56  ;;  %v3758_v0 = vld [vmem:[%s7324_s5 + $0x88] sm:$0xff]  ;;  %v3759_v48 = vld [vmem:[%s7324_s5 + $0x90] sm:$0xff]  ;;  %v3827_v51 = vld [vmem:[%s7324_s5 + $0x220] sm:$0xff] }
 0x241   : > { %v1757_v8 = vmax.f32 %v1753_v62, %v1755_v63  ;;  %v1932_v63 = vld [vmem:[%s7324_s5 + $0x38] sm:$0xff]  ;;  %v3828_v54 = vld [vmem:[%s7324_s5 + $0x228] sm:$0xff]  ;;  %v3842_v40 = vld [vmem:[%s7324_s5 + $0x280] sm:$0xff] }
 0x242   : > { %v1756_v9 = vmax.f32 %v1752_v2, %v1754_v3  ;;  %v5407_v2 = vpack.c.bf16 %v1932_v63, %v1931_v59  ;;  %v5447_v3 = vpack.c.bf16 %v3759_v48, %v3758_v0  ;;  %v3841_v56 = vld [vmem:[%s7324_s5 + $0x278] sm:$0xff]  ;;  %v3829_v59 = vld [vmem:[%s7324_s5 + $0x230] sm:$0xff]  ;;  %v3843_v63 = vld [vmem:[%s7324_s5 + $0x288] sm:$0xff] }
 0x243   : > { %v1766_v10 = vadd.f32 %v3741_v1, %v1757_v8  ;;  %v1933_v8 = vld [vmem:[%s7324_s5 + $0x40] sm:$0xff]  ;;  %v3844_v0 = vld [vmem:[%s7324_s5 + $0x290] sm:$0xff] }
 0x244   : > { %v1765_v7 = vadd.f32 %v3741_v1, %v1756_v9 }
 0x245   : > { %5776 = vtanh.f32 %v1766_v10  ;;  %v1934_v10 = vld [vmem:[%s7324_s5 + $0x48] sm:$0xff] }
 0x246   : > { %5778 = vtanh.f32 %v1765_v7  ;;  %v3760_v7 = vld [vmem:[%s7324_s5 + $0x98] sm:$0xff] }
 0x24f   : > { %v5777_v6 = vpop.eup %5776 }
 0x250   : > { %v5779_v13 = vpop.eup %5778 }
 0x251   : > { %v5371_v14 = vpack.c.bf16 %v5777_v6, %v5779_v13  ;;  %v5411_v6 = vpack.c.bf16 %v1934_v10, %v1933_v8  ;;  %v5451_v13 = vpack.c.bf16 %v3761_v11, %v3760_v7  ;;  %v3832_v8 = vld [vmem:[%s7324_s5 + $0x248] sm:$0xff]  ;;  %v3845_v10 = vld [vmem:[%s7324_s5 + $0x298] sm:$0xff] }
 0x253   : > { %5372 = vmatprep.subr.bf16.mxu1 %v5371_v14 }
 0x254   : > { %5374 = vmatpush3.bf16.msra.mxu1 %v5371_v14 }
 0x255   : > { %5376 = vmatprep.subr.bf16.mxu1 %v5375_v15 }
 0x257   : > { %4686 = vmatmul.mubr.msk.f32.vlgmr.msra.gmra.mrb[4].mxu1 %vm1779_vm2, %v1770_v18  ;;  %v3798_v18 = vld [vmem:[%s7324_s5 + $0x168] sm:$0xff] }
 0x258   : > { %4688 = vmatprep.mubr.msk.f32.mxu1 %vm1779_vm2, %v1771_v19  ;;  %5378 = vmatpush3.bf16.msra.mxu1 %v5375_v15  ;;  %v1935_v15 = vld [vmem:[%s7324_s5 + $0x50] sm:$0xf]  ;;  %v3811_v19 = vld [vmem:[%s7324_s5 + $0x1b8] sm:$0xff] }
 0x259   : > { %5380 = vmatprep.subr.bf16.mxu1 %v5379_v20 }
 0x25b   : > { %4689 = vmatmul.mubr.msk.f32.gmra.mrb[6].mxu1 %vm1779_vm2, %v1772_v23  ;;  %v3813_v23 = vld [vmem:[%s7324_s5 + $0x1c8] sm:$0xff] }
 0x25c   : > { %4691 = vmatprep.mubr.msk.f32.mxu1 %vm1779_vm2, %v1773_v24  ;;  %5382 = vmatpush3.bf16.msra.mxu1 %v5379_v20  ;;  %v3812_v20 = vld [vmem:[%s7324_s5 + $0x1c0] sm:$0xff]  ;;  %v3814_v24 = vld [vmem:[%s7324_s5 + $0x1d0] sm:$0xff] }
 0x25d   : > { %5384 = vmatprep.subr.bf16.mxu1 %v5383_v25  ;;  %v5475_v44 = vpack.c.bf16 %v3812_v20, %v3811_v19  ;;  %v3849_v19 = vld [vmem:[%s7324_s5 + $0x2b8] sm:$0xf]  ;;  %v3853_v20 = vld [vmem:[%s7324_s5 + $0x2c0] sm:$0xff] }
 0x25f   : > { %4692 = vmatmul.mubr.msk.f32.gmra.mrb[8].mxu1 %vm1779_vm2, %v1774_v27  ;;  %v5479_v27 = vpack.c.bf16 %v3814_v24, %v3813_v23  ;;  %v3868_v23 = vld [vmem:[%s7324_s5 + $0x320] sm:$0xff]  ;;  %v3855_v24 = vld [vmem:[%s7324_s5 + $0x2d0] sm:$0xff] }
 0x260   : > { %4694 = vmatprep.mubr.msk.f32.mxu1 %vm1779_vm2, %v1775_v29  ;;  %5386 = vmatpush3.bf16.msra.mxu1 %v5383_v25  ;;  %v5455_v25 = vpack.c.bf16 %v3798_v18, %v3797_v17  ;;  %v3801_v29 = vld [vmem:[%s7324_s5 + $0x180] sm:$0xff] }
 0x261   : > { %5388 = vmatprep.subr.bf16.mxu1 %v5387_v55  ;;  %v3835_v18 = vld [vmem:[%s7324_s5 + $0x260] sm:$0xf] }
 0x263   : > { %4695 = vmatmul.mubr.msk.f32.gmra.mrb[10].mxu1 %vm1779_vm2, %v1776_v31 }
 0x264   : > { %4697 = vmatprep.mubr.msk.f32.mxu1 %vm1779_vm2, %v1777_v32  ;;  %5390 = vmatpush3.bf16.msra.mxu1 %v5387_v55  ;;  %v3802_v55 = vld [vmem:[%s7324_s5 + $0x188] sm:$0xff]  ;;  %v5483_v32 = vpack.c.bf16 %v3816_v52, %v3815_v30  ;;  %v3857_v52 = vld [vmem:[%s7324_s5 + $0x2e0] sm:$0xff] }
 0x265   : > { %5392 = vmatprep.subr.bf16.mxu1 %v5391_v33  ;;  %v5463_v31 = vpack.c.bf16 %v3802_v55, %v3801_v29  ;;  %v3870_v29 = vld [vmem:[%s7324_s5 + $0x330] sm:$0xff] }
 0x267   : > { %4698 = vmatmul.mubr.msk.f32.gmra.mrb[12].mxu1 %vm1779_vm2, %v1778_v34  ;;  %v3804_v34 = vld [vmem:[%s7324_s5 + $0x198] sm:$0xff] }
 0x268   : > { %5394 = vmatpush3.bf16.msra.mxu1 %v5391_v33  ;;  %v3803_v33 = vld [vmem:[%s7324_s5 + $0x190] sm:$0xff] }
 0x269   : > { %4720 = vmatprep.subr.msk.mxu1 %vm1967_vm3, %v3773_v35  ;;  %v5467_v37 = vpack.c.bf16 %v3804_v34, %v3803_v33  ;;  %v3872_v33 = vld [vmem:[%s7324_s5 + $0x340] sm:$0xff] }
 0x26c   : > { %4721 = vmatpush3.msk.msra.mxu1 %vm1967_vm3, %v3773_v35  ;;  %v3817_v35 = vld [vmem:[%s7324_s5 + $0x1e8] sm:$0xff] }
 0x26d   : > { %5396 = vmatprep.subr.bf16.mxu1 %v5395_v4  ;;  %v5487_v38 = vpack.c.bf16 %v3818_v61, %v3817_v35  ;;  %v3859_v61 = vld [vmem:[%s7324_s5 + $0x2f0] sm:$0xff] }
 0x32a   : > { %v6646_v5 = vpop.f32.mrb[4].mxu1 }
 0x32b   : > { %v1876_v42 = vpop.f32.mrb[5].mxu1 }
 0x32e   : > { %v4690_v49 = vpop.f32.mrb[6].mxu1 }
 0x32f   : > { %v1886_v50 = vpop.f32.mrb[7].mxu1 }
 0x330   : > { %4722 = vmatprep.mubr.msk.f32.mxu1 %vm1960_vm4, %v1886_v50  ;;  %4772 = vmatprep.mubr.msk.f32.mxu0 %vm1960_vm4, %v1886_v50  ;;  %v3840_v50 = vld [vmem:[%s7324_s5 + $0x270] sm:$0xff] }
 0x331   : > { %4723 = vmatmul.mubr.msk.f32.vlgmr.msra.gmra.mrb[14].mxu1 %vm1960_vm4, %v4690_v49  ;;  %4773 = vmatmul.mubr.msk.f32.vlgmr.msra.gmra.mrb[24].mxu0 %vm1960_vm4, %v4690_v49  ;;  %v3839_v49 = vld [vmem:[%s7324_s5 + $0x268] sm:$0xff] }
 0x332   : > { %5398 = vmatpush3.bf16.msra.mxu1 %v5395_v4  ;;  %5438 = vmatpush3.bf16.msra.mxu0 %v5435_v41  ;;  %v6676_v57 = vpop.f32.mrb[8].mxu1  ;;  %v3819_v4 = vld [vmem:[%s7324_s5 + $0x1f8] sm:$0xff]  ;;  %v3820_v41 = vld [vmem:[%s7324_s5 + $0x200] sm:$0xff] }
 0x333   : > { %4747 = vmatprep.mubr.msk.f32.mxu1 %vm1960_vm4, %v1876_v42  ;;  %4797 = vmatprep.mubr.msk.f32.mxu0 %vm1960_vm4, %v1876_v42  ;;  %v6683_v62 = vpop.f32.mrb[9].mxu1  ;;  %v5491_v42 = vpack.c.bf16 %v3820_v41, %v3819_v4  ;;  %v3861_v4 = vld [vmem:[%s7324_s5 + $0x300] sm:$0xff]  ;;  %v3862_v41 = vld [vmem:[%s7324_s5 + $0x308] sm:$0xff] }
 0x334   : > { %5400 = vmatprep.subr.bf16.mxu1 %v5399_v28  ;;  %5440 = vmatprep.subr.bf16.mxu0 %v5439_v53 }
 0x336   : > { %5402 = vmatpush3.bf16.msra.mxu1 %v5399_v28  ;;  %5442 = vmatpush3.bf16.msra.mxu0 %v5439_v53  ;;  %v6694_v1 = vpop.f32.mrb[10].mxu1  ;;  %v5495_v28 = vpack.c.bf16 %v3826_v47, %v3825_v46  ;;  %v5515_v53 = vpack.c.bf16 %v3840_v50, %v3839_v49  ;;  %v3877_v46 = vld [vmem:[%s7324_s5 + $0x368] sm:$0xf]  ;;  %v2880_v47 = vld [vmem:[%s7326_s7] sm:$0xff] }
 0x337   : > { %5404 = vmatprep.subr.bf16.mxu1 %v5403_v36  ;;  %5444 = vmatprep.subr.bf16.mxu0 %v5443_v58  ;;  %v6699_v9 = vpop.f32.mrb[11].mxu1  ;;  %v2881_v49 = vld [vmem:[%s7326_s7 + $0x8] sm:$0xff] }
 0x338   : > { %v5591_v50 = vpack.c.bf16 %v2881_v49, %v2880_v47  ;;  %v3901_v47 = vld [vmem:[%s7326_s7 + $0xd8] sm:$0xff] }
 0x33a   : > { %5406 = vmatpush3.bf16.msra.mxu1 %v5403_v36  ;;  %5446 = vmatpush3.bf16.msra.mxu0 %v5443_v58  ;;  %v6710_v12 = vpop.f32.mrb[12].mxu1  ;;  %v5499_v36 = vpack.c.bf16 %v3828_v54, %v3827_v51  ;;  %v5519_v58 = vpack.c.bf16 %v3842_v40, %v3841_v56  ;;  %v5854_v51 = vmov 0.0|0.0   ;;  %v2883_v56 = vld [vmem:[%s7326_s7 + $0x18] sm:$0xff] }
 0x33b   : > { %5408 = vmatprep.subr.bf16.mxu1 %v5407_v2  ;;  %5448 = vmatprep.subr.bf16.mxu0 %v5447_v3  ;;  %v6712_v14 = vpop.f32.mrb[13].mxu1 }
 0x33e   : > { %5410 = vmatpush3.bf16.msra.mxu1 %v5407_v2  ;;  %5450 = vmatpush3.bf16.msra.mxu0 %v5447_v3  ;;  %v5523_v2 = vpack.c.bf16 %v3844_v0, %v3843_v63  ;;  %v3831_v3 = vld [vmem:[%s7324_s5 + $0x240] sm:$0xff]  ;;  %v2885_v63 = vld [vmem:[%s7326_s7 + $0x28] sm:$0xff] }
 0x33f   : > { %5412 = vmatprep.subr.bf16.mxu1 %v5411_v6  ;;  %5452 = vmatprep.subr.bf16.mxu0 %v5451_v13  ;;  %v5507_v7 = vpack.c.bf16 %v3832_v8, %v3831_v3  ;;  %v2886_v8 = vld [vmem:[%s7326_s7 + $0x30] sm:$0xff] }
 0x342   : > { %5414 = vmatpush3.bf16.msra.mxu1 %v5411_v6  ;;  %5454 = vmatpush3.bf16.msra.mxu0 %v5451_v13  ;;  %v3833_v6 = vld [vmem:[%s7324_s5 + $0x250] sm:$0xff]  ;;  %v3834_v13 = vld [vmem:[%s7324_s5 + $0x258] sm:$0xff] }
 0x343   : > { %4745 = vmatprep.subr.msk.mxu1 %vm1967_vm3, %v1935_v15  ;;  %4795 = vmatprep.subr.msk.mxu0 %vm1967_vm3, %v3762_v16 }
 0x346   : > { %4746 = vmatpush3.msk.msra.mxu1 %vm1967_vm3, %v1935_v15  ;;  %4796 = vmatpush3.msk.msra.mxu0 %vm1967_vm3, %v3762_v16  ;;  %v3847_v15 = vld [vmem:[%s7324_s5 + $0x2a8] sm:$0xff]  ;;  %v5511_v16 = vpack.c.bf16 %v3834_v13, %v3833_v6  ;;  %v2888_v6 = vld [vmem:[%s7326_s7 + $0x40] sm:$0xff] }
 0x347   : > { %4748 = vmatmul.mubr.msk.f32.vlgmr.msra.gmra.mrb[14].mxu1 %vm1960_vm4, %v6646_v5  ;;  %4798 = vmatmul.mubr.msk.f32.vlgmr.msra.gmra.mrb[24].mxu0 %vm1960_vm4, %v6646_v5  ;;  %v5471_v5 = vpack.c.bf16 %v3806_v60, %v3805_v39  ;;  %v2889_v13 = vld [vmem:[%s7326_s7 + $0x48] sm:$0xff] }
 0x348   : > { %5456 = vmatprep.subr.bf16.mxu1 %v5455_v25  ;;  %5476 = vmatprep.subr.bf16.mxu0 %v5475_v44 }
 0x349   : > { %5458 = vmatpush3.bf16.msra.mxu1 %v5455_v25  ;;  %5478 = vmatpush3.bf16.msra.mxu0 %v5475_v44  ;;  %v5535_v25 = vpack.c.bf16 %v3854_v21, %v3853_v20  ;;  %v5555_v44 = vpack.c.bf16 %v3868_v23, %v3867_v22 }
 0x34a   : > { %5460 = vmatprep.subr.bf16.mxu1 %v5459_v26  ;;  %5480 = vmatprep.subr.bf16.mxu0 %v5479_v27 }
 0x34b   : > { %4822 = vmatprep.mubr.msk.f32.mxu1 %vm1960_vm4, %v6683_v62  ;;  %4847 = vmatprep.mubr.msk.f32.mxu0 %vm1960_vm4, %v6683_v62  ;;  %v3830_v62 = vld [vmem:[%s7324_s5 + $0x238] sm:$0xff] }
 0x34c   : > { %v5503_v48 = vpack.c.bf16 %v3830_v62, %v3829_v59  ;;  %v2884_v62 = vld [vmem:[%s7326_s7 + $0x20] sm:$0xff] }
 0x34d   : > { %5462 = vmatpush3.bf16.msra.mxu1 %v5459_v26  ;;  %5482 = vmatpush3.bf16.msra.mxu0 %v5479_v27  ;;  %v3856_v26 = vld [vmem:[%s7324_s5 + $0x2d8] sm:$0xff]  ;;  %v3869_v27 = vld [vmem:[%s7324_s5 + $0x328] sm:$0xff]  ;;  %v5597_v0 = vpack.c.bf16 %v2885_v63, %v2884_v62 }
 0x34e   : > { %5464 = vmatprep.subr.bf16.mxu1 %v5463_v31  ;;  %5484 = vmatprep.subr.bf16.mxu0 %v5483_v32  ;;  %v5539_v55 = vpack.c.bf16 %v3856_v26, %v3855_v24  ;;  %v5559_v30 = vpack.c.bf16 %v3870_v29, %v3869_v27  ;;  %v3905_v29 = vld [vmem:[%s7326_s7 + $0xf0] sm:$0xff] }
 0x351   : > { %5466 = vmatpush3.bf16.msra.mxu1 %v5463_v31  ;;  %5486 = vmatpush3.bf16.msra.mxu0 %v5483_v32  ;;  %v3858_v31 = vld [vmem:[%s7324_s5 + $0x2e8] sm:$0xff]  ;;  %v3871_v32 = vld [vmem:[%s7324_s5 + $0x338] sm:$0xff] }
 0x352   : > { %5468 = vmatprep.subr.bf16.mxu1 %v5467_v37  ;;  %5488 = vmatprep.subr.bf16.mxu0 %v5487_v38  ;;  %v5543_v34 = vpack.c.bf16 %v3858_v31, %v3857_v52  ;;  %v5563_v35 = vpack.c.bf16 %v3872_v33, %v3871_v32  ;;  %v3895_v52 = vld [vmem:[%s7326_s7 + $0xa8] sm:$0xff]  ;;  %v3907_v32 = vld [vmem:[%s7326_s7 + $0x100] sm:$0xff] }
 0x353   : > { %v3908_v33 = vld [vmem:[%s7326_s7 + $0x108] sm:$0xff] }
 0x355   : > { %5470 = vmatpush3.bf16.msra.mxu1 %v5467_v37  ;;  %5490 = vmatpush3.bf16.msra.mxu0 %v5487_v38  ;;  %v3860_v37 = vld [vmem:[%s7324_s5 + $0x2f8] sm:$0xff]  ;;  %v3873_v38 = vld [vmem:[%s7324_s5 + $0x348] sm:$0xff] }
 0x356   : > { %5472 = vmatprep.subr.bf16.mxu1 %v5471_v5  ;;  %5492 = vmatprep.subr.bf16.mxu0 %v5491_v42  ;;  %v5547_v39 = vpack.c.bf16 %v3860_v37, %v3859_v61  ;;  %v3896_v37 = vld [vmem:[%s7326_s7 + $0xb0] sm:$0xff] }
 0x359   : > { %5474 = vmatpush3.bf16.msra.mxu1 %v5471_v5  ;;  %5494 = vmatpush3.bf16.msra.mxu0 %v5491_v42  ;;  %v3875_v5 = vld [vmem:[%s7324_s5 + $0x358] sm:$0xff]  ;;  %v5551_v42 = vpack.c.bf16 %v3862_v41, %v3861_v4  ;;  %v3898_v41 = vld [vmem:[%s7326_s7 + $0xc0] sm:$0xff] }
 0x35a   : > { %4820 = vmatprep.subr.msk.mxu1 %vm1967_vm3, %v3807_v43  ;;  %4845 = vmatprep.subr.msk.mxu0 %vm1967_vm3, %v3821_v45 }
 0x35d   : > { %4821 = vmatpush3.msk.msra.mxu1 %vm1967_vm3, %v3807_v43  ;;  %4846 = vmatpush3.msk.msra.mxu0 %vm1967_vm3, %v3821_v45  ;;  %v3863_v45 = vld [vmem:[%s7324_s5 + $0x310] sm:$0xf] }
 0x35e   : > { %5496 = vmatprep.subr.bf16.mxu1 %v5495_v28  ;;  %5516 = vmatprep.subr.bf16.mxu0 %v5515_v53 }
 0x35f   : > { %4823 = vmatmul.mubr.msk.f32.vlgmr.msra.gmra.mrb[14].mxu1 %vm1960_vm4, %v6676_v57  ;;  %4848 = vmatmul.mubr.msk.f32.vlgmr.msra.gmra.mrb[24].mxu0 %vm1960_vm4, %v6676_v57  ;;  %v3846_v57 = vld [vmem:[%s7324_s5 + $0x2a0] sm:$0xff] }
 0x360   : > { %5498 = vmatpush3.bf16.msra.mxu1 %v5495_v28  ;;  %5518 = vmatpush3.bf16.msra.mxu0 %v5515_v53  ;;  %v5527_v11 = vpack.c.bf16 %v3846_v57, %v3845_v10  ;;  %v3882_v28 = vld [vmem:[%s7326_s7 + $0x50] sm:$0xff]  ;;  %v3883_v53 = vld [vmem:[%s7326_s7 + $0x58] sm:$0xff]  ;;  %v3888_v57 = vld [vmem:[%s7326_s7 + $0x80] sm:$0xff] }
 0x361   : > { %5500 = vmatprep.subr.bf16.mxu1 %v5499_v36  ;;  %5520 = vmatprep.subr.bf16.mxu0 %v5519_v58  ;;  %v5576_v54 = vpack.c.bf16 %v3883_v53, %v3882_v28  ;;  %v2887_v10 = vld [vmem:[%s7326_s7 + $0x38] sm:$0xff] }
 0x362   : > { %4872 = vmatprep.mubr.msk.f32.mxu1 %vm1960_vm4, %v6699_v9  ;;  %4897 = vmatprep.mubr.msk.f32.mxu0 %vm1960_vm4, %v6699_v9  ;;  %v3848_v9 = vld [vmem:[%s7324_s5 + $0x2b0] sm:$0xff]  ;;  %v3914_v28 = vld [vmem:[%s7326_s7 + $0x138] sm:$0xff] }
 0x363   : > { %v5531_v17 = vpack.c.bf16 %v3848_v9, %v3847_v15  ;;  %v5856_v15 = vmov 0.0  }
 0x364   : > { %5502 = vmatpush3.bf16.msra.mxu1 %v5499_v36  ;;  %5522 = vmatpush3.bf16.msra.mxu0 %v5519_v58  ;;  %v3884_v36 = vld [vmem:[%s7326_s7 + $0x60] sm:$0xff]  ;;  %v3885_v58 = vld [vmem:[%s7326_s7 + $0x68] sm:$0xff] }
 0x365   : > { %5504 = vmatprep.subr.bf16.mxu1 %v5503_v48  ;;  %5524 = vmatprep.subr.bf16.mxu0 %v5523_v2  ;;  %v5579_v59 = vpack.c.bf16 %v3885_v58, %v3884_v36  ;;  %v3916_v36 = vld [vmem:[%s7326_s7 + $0x140] sm:$0xff]  ;;  %v3917_v58 = vld [vmem:[%s7326_s7 + $0x148] sm:$0xff] }
 0x366   : > { %v5636_v62 = vpack.c.bf16 %v3917_v58, %v3916_v36  ;;  %v3401_v58 = vld [vmem:[%s7330_s11 + $0x20] sm:$0xff] }
 0x368   : > { %5506 = vmatpush3.bf16.msra.mxu1 %v5503_v48  ;;  %5526 = vmatpush3.bf16.msra.mxu0 %v5523_v2  ;;  %v3886_v48 = vld [vmem:[%s7326_s7 + $0x70] sm:$0xff]  ;;  %v3887_v2 = vld [vmem:[%s7326_s7 + $0x78] sm:$0xff] }
 0x369   : > { %5508 = vmatprep.subr.bf16.mxu1 %v5507_v7  ;;  %5528 = vmatprep.subr.bf16.mxu0 %v5527_v11  ;;  %v5582_v3 = vpack.c.bf16 %v3887_v2, %v3886_v48  ;;  %v3919_v48 = vld [vmem:[%s7326_s7 + $0x158] sm:$0xff] }
 0x36c   : > { %5510 = vmatpush3.bf16.msra.mxu1 %v5507_v7  ;;  %5530 = vmatpush3.bf16.msra.mxu0 %v5527_v11  ;;  %v5600_v7 = vpack.c.bf16 %v2887_v10, %v2886_v8  ;;  %v3889_v11 = vld [vmem:[%s7326_s7 + $0x88] sm:$0xff] }
 0x36d   : > { %5512 = vmatprep.subr.bf16.mxu1 %v5511_v16  ;;  %5532 = vmatprep.subr.bf16.mxu0 %v5531_v17  ;;  %v5585_v9 = vpack.c.bf16 %v3889_v11, %v3888_v57  ;;  %v3921_v8 = vld [vmem:[%s7326_s7 + $0x168] sm:$0xff]  ;;  %v3922_v57 = vld [vmem:[%s7326_s7 + $0x170] sm:$0xff] }
 0x370   : > { %5514 = vmatpush3.bf16.msra.mxu1 %v5511_v16  ;;  %5534 = vmatpush3.bf16.msra.mxu0 %v5531_v17  ;;  %v3890_v16 = vld [vmem:[%s7326_s7 + $0x90] sm:$0xff]  ;;  %v3891_v17 = vld [vmem:[%s7326_s7 + $0x98] sm:$0xff] }
 0x371   : > { %4870 = vmatprep.subr.msk.mxu1 %vm1967_vm3, %v3835_v18  ;;  %4895 = vmatprep.subr.msk.mxu0 %vm1967_vm3, %v3849_v19 }
 0x374   : > { %4871 = vmatpush3.msk.msra.mxu1 %vm1967_vm3, %v3835_v18  ;;  %4896 = vmatpush3.msk.msra.mxu0 %vm1967_vm3, %v3849_v19  ;;  %v5603_v18 = vpack.c.bf16 %v2889_v13, %v2888_v6  ;;  %v5588_v19 = vpack.c.bf16 %v3891_v17, %v3890_v16  ;;  %v3924_v6 = vld [vmem:[%s7326_s7 + $0x180] sm:$0xff]  ;;  %v3925_v13 = vld [vmem:[%s7326_s7 + $0x188] sm:$0xff] }
 0x375   : > { %5536 = vmatprep.subr.bf16.mxu1 %v5535_v25  ;;  %5556 = vmatprep.subr.bf16.mxu0 %v5555_v44  ;;  %v3306_v17 = vld [vmem:[%s7328_s9] sm:$0xff] }
 0x376   : > { %4873 = vmatmul.mubr.msk.f32.vlgmr.msra.gmra.mrb[14].mxu1 %vm1960_vm4, %v6694_v1  ;;  %4898 = vmatmul.mubr.msk.f32.vlgmr.msra.gmra.mrb[24].mxu0 %vm1960_vm4, %v6694_v1  ;;  %v3874_v1 = vld [vmem:[%s7324_s5 + $0x350] sm:$0xff] }
 0x377   : > { %5538 = vmatpush3.bf16.msra.mxu1 %v5535_v25  ;;  %5558 = vmatpush3.bf16.msra.mxu0 %v5555_v44  ;;  %v5567_v60 = vpack.c.bf16 %v3874_v1, %v3873_v38  ;;  %v3881_v44 = vld [vmem:[%s7325_s6] ss:$0 sm:$0xff]  ;;  %v3897_v38 = vld [vmem:[%s7326_s7 + $0xb8] sm:$0xff]  ;;  %v5624_v1 = vpack.c.bf16 %v3908_v33, %v3907_v32 }
 0x378   : > { %5540 = vmatprep.subr.bf16.mxu1 %v5539_v55  ;;  %5560 = vmatprep.subr.bf16.mxu0 %v5559_v30  ;;  %v5609_v4 = vpack.c.bf16 %v3897_v38, %v3896_v37  ;;  %v3318_v33 = vld [vmem:[%s7328_s9 + $0x60] sm:$0xff]  ;;  %v3398_v38 = vld [vmem:[%s7330_s11 + $0x8] sm:$0xff] }
 0x379   : > { %4922 = vmatprep.mubr.msk.f32.mxu1 %vm1960_vm4, %v6712_v14  ;;  %4947 = vmatprep.mubr.msk.f32.mxu0 %vm1960_vm4, %v6712_v14  ;;  %v3876_v14 = vld [vmem:[%s7324_s5 + $0x360] sm:$0xff] }
 0x37a   : > { %v5571_v43 = vpack.c.bf16 %v3876_v14, %v3875_v5  ;;  %v3899_v5 = vld [vmem:[%s7326_s7 + $0xc8] sm:$0xff]  ;;  %v3397_v37 = vld [vmem:[%s7330_s11] sm:$0xff] }
 0x37b   : > { %5542 = vmatpush3.bf16.msra.mxu1 %v5539_v55  ;;  %5562 = vmatpush3.bf16.msra.mxu0 %v5559_v30  ;;  %v3906_v55 = vld [vmem:[%s7326_s7 + $0xf8] sm:$0xff]  ;;  %v3894_v30 = vld [vmem:[%s7326_s7 + $0xa0] sm:$0xff] }
 0x37c   : > { %5544 = vmatprep.subr.bf16.mxu1 %v5543_v34  ;;  %5564 = vmatprep.subr.bf16.mxu0 %v5563_v35  ;;  %v5621_v31 = vpack.c.bf16 %v3906_v55, %v3905_v29  ;;  %v3314_v29 = vld [vmem:[%s7328_s9 + $0x40] sm:$0xff]  ;;  %v3315_v55 = vld [vmem:[%s7328_s9 + $0x48] sm:$0xff] }
 0x37f   : > { %5546 = vmatpush3.bf16.msra.mxu1 %v5543_v34  ;;  %5566 = vmatpush3.bf16.msra.mxu0 %v5563_v35  ;;  %v5606_v35 = vpack.c.bf16 %v3895_v52, %v3894_v30  ;;  %v5663_v30 = vpack.c.bf16 %v3315_v55, %v3314_v29  ;;  %v3316_v52 = vld [vmem:[%s7328_s9 + $0x50] sm:$0xff] }
 0x380   : > { %5548 = vmatprep.subr.bf16.mxu1 %v5547_v39  ;;  %5568 = vmatprep.subr.bf16.mxu0 %v5567_v60 }
 0x383   : > { %5550 = vmatpush3.bf16.msra.mxu1 %v5547_v39  ;;  %5570 = vmatpush3.bf16.msra.mxu0 %v5567_v60  ;;  %v3909_v39 = vld [vmem:[%s7326_s7 + $0x110] sm:$0xff]  ;;  %v3910_v60 = vld [vmem:[%s7326_s7 + $0x118] sm:$0xff] }
 0x384   : > { %5552 = vmatprep.subr.bf16.mxu1 %v5551_v42  ;;  %5572 = vmatprep.subr.bf16.mxu0 %v5571_v43  ;;  %v5627_v14 = vpack.c.bf16 %v3910_v60, %v3909_v39  ;;  %v5672_v39 = vpack.c.bf16 %v3398_v38, %v3397_v37  ;;  %v3400_v60 = vld [vmem:[%s7330_s11 + $0x18] sm:$0xff] }
 0x387   : > { %5554 = vmatpush3.bf16.msra.mxu1 %v5551_v42  ;;  %5574 = vmatpush3.bf16.msra.mxu0 %v5571_v43  ;;  %v3911_v42 = vld [vmem:[%s7326_s7 + $0x120] sm:$0xff]  ;;  %v3912_v43 = vld [vmem:[%s7326_s7 + $0x128] sm:$0xff] }
 0x388   : > { %4920 = vmatprep.subr.msk.mxu1 %vm1967_vm3, %v3863_v45  ;;  %4945 = vmatprep.subr.msk.mxu0 %vm1967_vm3, %v3877_v46  ;;  %v5630_v49 = vpack.c.bf16 %v3912_v43, %v3911_v42 }
 0x38b   : > { %4921 = vmatpush3.msk.msra.mxu1 %vm1967_vm3, %v3863_v45  ;;  %4946 = vmatpush3.msk.msra.mxu0 %vm1967_vm3, %v3877_v46  ;;  %v5612_v45 = vpack.c.bf16 %v3899_v5, %v3898_v41  ;;  %v3900_v46 = vld [vmem:[%s7326_s7 + $0xd0] sm:$0xff] }
 0x38c   : > { %4923 = vmatmul.mubr.msk.f32.vlgmr.msra.gmra.mrb[14].mxu1 %vm1960_vm4, %v6710_v12  ;;  %4948 = vmatmul.mubr.msk.f32.vlgmr.msra.gmra.mrb[24].mxu0 %vm1960_vm4, %v6710_v12  ;;  %v2882_v12 = vld [vmem:[%s7326_s7 + $0x10] sm:$0xff]  ;;  %v5615_v53 = vpack.c.bf16 %v3901_v47, %v3900_v46 }
 0x38d   : > { %5590 = vmatprep.subr.bf16.mxu0 %v5854_v51  ;;  %5575 = vmatprep.subr.bf16.mxu1 %v5854_v51  ;;  %v5594_v40 = vpack.c.bf16 %v2883_v56, %v2882_v12  ;;  %v3903_v12 = vld [vmem:[%s7326_s7 + $0xe8] sm:$0xff] }
 0x38e   : > { %5592 = vmatpush3.bf16.msra.mxu0 %v5591_v50  ;;  %5577 = vmatpush3.bf16.msra.mxu1 %v5576_v54  ;;  %v3913_v50 = vld [vmem:[%s7326_s7 + $0x130] sm:$0xff]  ;;  %v3902_v54 = vld [vmem:[%s7326_s7 + $0xe0] sm:$0xff] }
 0x38f   : > { %5593 = vmatprep.subr.bf16.mxu0 %v5854_v51  ;;  %5578 = vmatprep.subr.bf16.mxu1 %v5854_v51  ;;  %v5633_v56 = vpack.c.bf16 %v3914_v28, %v3913_v50 }
 0x390   : > { %4993 = vmatprep.mubr.msk.f32.mxu0 %vm5855_vm5, %v5856_v15  ;;  %4970 = vmatprep.mubr.msk.f32.mxu1 %vm5855_vm5, %v5856_v15 }
 0x392   : > { %5595 = vmatpush3.bf16.msra.mxu0 %v5594_v40  ;;  %5580 = vmatpush3.bf16.msra.mxu1 %v5579_v59  ;;  %v5618_v40 = vpack.c.bf16 %v3903_v12, %v3902_v54  ;;  %v3303_v54 = vld [vmem:[%s7327_s8] sm:$0x1] }
 0x393   : > { %5596 = vmatprep.subr.bf16.mxu0 %v5854_v51  ;;  %5581 = vmatprep.subr.bf16.mxu1 %v5854_v51 }
 0x396   : > { %5598 = vmatpush3.bf16.msra.mxu0 %v5597_v0  ;;  %5583 = vmatpush3.bf16.msra.mxu1 %v5582_v3  ;;  %v3918_v0 = vld [vmem:[%s7326_s7 + $0x150] sm:$0xff]  ;;  %v3920_v3 = vld [vmem:[%s7326_s7 + $0x160] sm:$0xff] }
 0x397   : > { %5599 = vmatprep.subr.bf16.mxu0 %v5854_v51  ;;  %5584 = vmatprep.subr.bf16.mxu1 %v5854_v51  ;;  %v5639_v2 = vpack.c.bf16 %v3919_v48, %v3918_v0  ;;  %v5642_v10 = vpack.c.bf16 %v3921_v8, %v3920_v3  ;;  %v3404_v0 = vld [vmem:[%s7330_s11 + $0x38] sm:$0xff]  ;;  %v3406_v3 = vld [vmem:[%s7330_s11 + $0x48] sm:$0xff] }
 0x39a   : > { %5601 = vmatpush3.bf16.msra.mxu0 %v5600_v7  ;;  %5586 = vmatpush3.bf16.msra.mxu1 %v5585_v9  ;;  %v3923_v7 = vld [vmem:[%s7326_s7 + $0x178] sm:$0xff]  ;;  %v5648_v9 = vpack.c.bf16 %v3925_v13, %v3924_v6 }
 0x39b   : > { %5602 = vmatprep.subr.bf16.mxu0 %v5854_v51  ;;  %5587 = vmatprep.subr.bf16.mxu1 %v5854_v51  ;;  %v5645_v11 = vpack.c.bf16 %v3923_v7, %v3922_v57  ;;  %v3321_v57 = vld [vmem:[%s7329_s10] sm:$0x1] }
 0x39e   : > { %5604 = vmatpush3.bf16.msra.mxu0 %v5603_v18  ;;  %5589 = vmatpush3.bf16.msra.mxu1 %v5588_v19  ;;  %v3307_v18 = vld [vmem:[%s7328_s9 + $0x8] sm:$0xff]  ;;  %v3308_v19 = vld [vmem:[%s7328_s9 + $0x10] sm:$0xff] }
 0x39f   : > { %5620 = vmatprep.subr.bf16.mxu0 %v5854_v51  ;;  %5605 = vmatprep.subr.bf16.mxu1 %v5854_v51 }
 0x45f   : > { %v4924_v20 = vpop.f32.mrb[14].mxu1  ;;  %v4949_v21 = vpop.f32.mrb[24].mxu0 }
 0x460   : > { %v2765_v22 = vpop.f32.mrb[15].mxu1  ;;  %v2857_v23 = vpop.f32.mrb[25].mxu0 }
 0x461   : > { %v2868_v24 = vmax.f32 %v2765_v22, %v4924_v20  ;;  %v2869_v25 = vmax.f32 %v2857_v23, %v4949_v21  ;;  %v5651_v20 = vpack.c.bf16 %v3307_v18, %v3306_v17  ;;  %v3309_v21 = vld [vmem:[%s7328_s9 + $0x18] sm:$0xff]  ;;  %v3310_v23 = vld [vmem:[%s7328_s9 + $0x20] sm:$0xff] }
 0x462   : > { %v5654_v22 = vpack.c.bf16 %v3309_v21, %v3308_v19 }
 0x463   : > { %v2870_v26 = vmax.f32 %v2868_v24, %v2869_v25  ;;  %v3311_v24 = vld [vmem:[%s7328_s9 + $0x28] sm:$0xff] }
 0x464   : > { %v5657_v25 = vpack.c.bf16 %v3311_v24, %v3310_v23 }
 0x465   : > { %v2878_v27 = vadd.f32 %v3881_v44, %v2870_v26  ;;  %v3312_v44 = vld [vmem:[%s7328_s9 + $0x30] sm:$0xff]  ;;  %v3313_v26 = vld [vmem:[%s7328_s9 + $0x38] sm:$0xff] }
 0x467   : > { %5780 = vtanh.f32 %v2878_v27  ;;  %v5660_v27 = vpack.c.bf16 %v3313_v26, %v3312_v44 }
 0x471   : > { %v7059_v34 = vpop.eup %5780 }
 0x472   : > { %4994 = vmatmul.mubr.msk.f32.vlgmr.msra.gmra.mrb[26].mxu0 %vm2903_vm6, %v7059_v34  ;;  %v2902_v61 = vrot.slane %v7059_v34, 1  ;;  %v3144_v59 = vrot.slane %v7059_v34, 3  ;;  %v3059_v63 = vrot.slane %v7059_v34, 2  ;;  %v3229_v16 = vrot.slane %v7059_v34, 4  ;;  %v3319_v34 = vld [vmem:[%s7328_s9 + $0x68] sm:$0xff] }
 0x473   : > { %5622 = vmatpush3.bf16.msra.mxu0 %v5621_v31  ;;  %5039 = vmatprep.mubr.msk.f32.mxu0 %vm5855_vm5, %v5856_v15  ;;  %v3317_v31 = vld [vmem:[%s7328_s9 + $0x58] sm:$0xff] }
 0x474   : > { %4971 = vmatmul.mubr.msk.f32.vlgmr.msra.gmra.mrb[16].mxu1 %vm2903_vm6, %v2902_v61  ;;  %5623 = vmatprep.subr.bf16.mxu0 %v5854_v51  ;;  %v5666_v32 = vpack.c.bf16 %v3317_v31, %v3316_v52  ;;  %v3320_v61 = vld [vmem:[%s7328_s9 + $0x70] sm:$0xff] }
 0x475   : > { %5607 = vmatpush3.bf16.msra.mxu1 %v5606_v35  ;;  %5016 = vmatprep.mubr.msk.f32.mxu1 %vm5855_vm5, %v5856_v15  ;;  %v5669_v35 = vpack.c.bf16 %v3319_v34, %v3318_v33 }
 0x476   : > { %5608 = vmatprep.subr.bf16.mxu1 %v5854_v51 }
 0x477   : > { %5625 = vmatpush3.bf16.msra.mxu0 %v5624_v1  ;;  %v3399_v1 = vld [vmem:[%s7330_s11 + $0x10] sm:$0xff] }
 0x478   : > { %5626 = vmatprep.subr.bf16.mxu0 %v5854_v51 }
 0x479   : > { %5610 = vmatpush3.bf16.msra.mxu1 %v5609_v4  ;;  %v5675_v4 = vpack.c.bf16 %v3400_v60, %v3399_v1 }
 0x47a   : > { %5611 = vmatprep.subr.bf16.mxu1 %v5854_v51 }
 0x47b   : > { %5628 = vmatpush3.bf16.msra.mxu0 %v5627_v14 }
 0x47c   : > { %5629 = vmatprep.subr.bf16.mxu0 %v5854_v51 }
 0x47d   : > { %5613 = vmatpush3.bf16.msra.mxu1 %v5612_v45 }
 0x47e   : > { %5614 = vmatprep.subr.bf16.mxu1 %v5854_v51 }
 0x47f   : > { %5631 = vmatpush3.bf16.msra.mxu0 %v5630_v49 }
 0x480   : > { %5632 = vmatprep.subr.bf16.mxu0 %v5854_v51 }
 0x481   : > { %5616 = vmatpush3.bf16.msra.mxu1 %v5615_v53 }
 0x482   : > { %5617 = vmatprep.subr.bf16.mxu1 %v5854_v51 }
 0x483   : > { %5634 = vmatpush3.bf16.msra.mxu0 %v5633_v56 }
 0x484   : > { %5650 = vmatprep.subr.bf16.mxu0 %v5854_v51 }
 0x485   : > { %5619 = vmatpush3.bf16.msra.mxu1 %v5618_v40 }
 0x486   : > { %5040 = vmatmul.mubr.msk.f32.vlgmr.msra.gmra.mrb[28].mxu0 %vm2903_vm6, %v3144_v59  ;;  %5635 = vmatprep.subr.bf16.mxu1 %v5854_v51  ;;  %v3402_v59 = vld [vmem:[%s7330_s11 + $0x28] sm:$0xff] }
 0x487   : > { %5095 = vmatprep.mubr.msk.f32.mxu0 %vm5855_vm5, %v5856_v15  ;;  %5652 = vmatpush3.bf16.msra.mxu0 %v5651_v20 }
 0x488   : > { %5017 = vmatmul.mubr.msk.f32.vlgmr.msra.gmra.mrb[18].mxu1 %vm2903_vm6, %v3059_v63  ;;  %5653 = vmatprep.subr.bf16.mxu0 %v5854_v51  ;;  %v3403_v63 = vld [vmem:[%s7330_s11 + $0x30] sm:$0xff] }
 0x489   : > { %5637 = vmatpush3.bf16.msra.mxu1 %v5636_v62  ;;  %5062 = vmatprep.mubr.msk.f32.mxu1 %vm5855_vm5, %v5856_v15  ;;  %v5678_v62 = vpack.c.bf16 %v3402_v59, %v3401_v58  ;;  %v5681_v48 = vpack.c.bf16 %v3404_v0, %v3403_v63 }
 0x48a   : > { %5638 = vmatprep.subr.bf16.mxu1 %v5854_v51 }
 0x48b   : > { %5655 = vmatpush3.bf16.msra.mxu0 %v5654_v22 }
 0x48c   : > { %5656 = vmatprep.subr.bf16.mxu0 %v5854_v51 }
 0x48d   : > { %5640 = vmatpush3.bf16.msra.mxu1 %v5639_v2  ;;  %v3405_v2 = vld [vmem:[%s7330_s11 + $0x40] sm:$0xff] }
 0x48e   : > { %5641 = vmatprep.subr.bf16.mxu1 %v5854_v51  ;;  %v5684_v8 = vpack.c.bf16 %v3406_v3, %v3405_v2 }
 0x48f   : > { %5658 = vmatpush3.bf16.msra.mxu0 %v5657_v25 }
 0x490   : > { %5659 = vmatprep.subr.bf16.mxu0 %v5854_v51 }
 0x491   : > { %5643 = vmatpush3.bf16.msra.mxu1 %v5642_v10  ;;  %v3407_v10 = vld [vmem:[%s7330_s11 + $0x50] sm:$0xf] }
 0x492   : > { %5644 = vmatprep.subr.bf16.mxu1 %v5854_v51 }
 0x493   : > { %5661 = vmatpush3.bf16.msra.mxu0 %v5660_v27 }
 0x494   : > { %5662 = vmatprep.subr.bf16.mxu0 %v5854_v51 }
 0x495   : > { %5646 = vmatpush3.bf16.msra.mxu1 %v5645_v11 }
 0x496   : > { %5647 = vmatprep.subr.bf16.mxu1 %v5854_v51 }
 0x497   : > { %5664 = vmatpush3.bf16.msra.mxu0 %v5663_v30 }
 0x498   : > { %5665 = vmatprep.subr.bf16.mxu0 %v5854_v51 }
 0x499   : > { %5649 = vmatpush3.bf16.msra.mxu1 %v5648_v9 }
 0x49a   : > { %5671 = vmatprep.subr.bf16.mxu1 %v5854_v51 }
 0x49b   : > { %5667 = vmatpush3.bf16.msra.mxu0 %v5666_v32 }
 0x49c   : > { %5063 = vmatmul.mubr.msk.f32.vlgmr.msra.gmra.mrb[20].mxu1 %vm2903_vm6, %v3229_v16  ;;  %5668 = vmatprep.subr.bf16.mxu0 %v5854_v51 }
 0x49d   : > { %5120 = vmatprep.mubr.msk.f32.mxu1 %vm5855_vm5, %v5856_v15  ;;  %5673 = vmatpush3.bf16.msra.mxu1 %v5672_v39 }
 0x49e   : > { %5674 = vmatprep.subr.bf16.mxu1 %v5854_v51 }
 0x49f   : > { %5670 = vmatpush3.bf16.msra.mxu0 %v5669_v35 }
 0x4a0   : > { %5093 = vmatprep.subr.mxu0 %v5856_v15 }
 0x4a1   : > { %5676 = vmatpush3.bf16.msra.mxu1 %v5675_v4 }
 0x4a2   : > { %5677 = vmatprep.subr.bf16.mxu1 %v5854_v51 }
 0x4a3   : > { %5094 = vmatpush3.msra.mxu0 %v3320_v61 }
 0x4a5   : > { %5679 = vmatpush3.bf16.msra.mxu1 %v5678_v62 }
 0x4a6   : > { %5680 = vmatprep.subr.bf16.mxu1 %v5854_v51 }
 0x4a9   : > { %5682 = vmatpush3.bf16.msra.mxu1 %v5681_v48 }
 0x4aa   : > { %5683 = vmatprep.subr.bf16.mxu1 %v5854_v51  ;;  %v3408_v51 = vld [vmem:[%s7331_s12] sm:$0x1] }
 0x4ad   : > { %5685 = vmatpush3.bf16.msra.mxu1 %v5684_v8 }
 0x4ae   : > { %5118 = vmatprep.subr.mxu1 %v5856_v15 }
 0x4b1   : > { %5119 = vmatpush3.msk.msra.mxu1 %vm1967_vm3, %v3407_v10 }
 0x545   : > { %v3044_v41 = vpop.f32.mrb[26].mxu0 }
 0x546   : > { %v4995_v5 = vpop.f32.mrb[27].mxu0 }
 0x547   : > { %v2972_v14 = vpop.f32.mrb[16].mxu1 }
 0x548   : > { %v3045_v42 = vadd.f32 %v3044_v41, %v2972_v14  ;;  %v4972_v43 = vpop.f32.mrb[17].mxu1 }
 0x559   : > { %v3213_v45 = vpop.f32.mrb[28].mxu0 }
 0x55a   : > { %v5041_v46 = vpop.f32.mrb[29].mxu0 }
 0x55b   : > { %v3128_v47 = vpop.f32.mrb[18].mxu1 }
 0x55c   : > { %v3132_v49 = vadd.f32 %v3128_v47, %v3045_v42  ;;  %v5018_v50 = vpop.f32.mrb[19].mxu1 }
 0x55e   : > { %v3217_v28 = vadd.f32 %v3213_v45, %v3132_v49 }
 0x56f   : > { %v3298_v53 = vpop.f32.mrb[20].mxu1 }
 0x570   : > { %v3302_v12 = vadd.f32 %v3298_v53, %v3217_v28  ;;  %v5064_v56 = vpop.f32.mrb[21].mxu1 }
 0x572   : > { %v3304_v40 = vadd.f32 %v3303_v54, %v3302_v12 }
 0x574   : > { %5782 = vtanh.f32 %v3304_v40 }
 0x57e   : > { %v5783_v36 = vpop.eup %5782 }
 0x57f   : > { %5096 = vmatmul.mubr.msk.f32.vlgmr.msra.gmra.mrb[30].mxu0 %vm3322_vm7, %v5783_v36 }
 0x652   : > { %v3392_v7 = vpop.f32.mrb[30].mxu0 }
 0x653   : > { %v3393_v11 = vadd.f32 %v3392_v7, %v3321_v57  ;;  %v5097_v6 = vpop.f32.mrb[31].mxu0 }
 0x655   : > { %5784 = vtanh.f32 %v3393_v11 }
 0x65f   : > { %v5785_v13 = vpop.eup %5784 }
 0x660   : > { %5121 = vmatmul.mubr.msk.f32.vlgmr.msra.gmra.mrb[22].mxu1 %vm1960_vm4, %v5785_v13 }
 0x733   : > { %v3481_v15 = vpop.f32.mrb[22].mxu1 }
 0x734   : > { %v3482_v9 = vadd.f32 %v3481_v15, %v3408_v51  ;;  %v5122_v16 = vpop.f32.mrb[23].mxu1 }
 0x736   : > { %v3486_v17 = vsel %vm3485_vm8, %v3482_v9, -inf }
 0x737   : > { %3487 = vmax.xlane.f32.xlu0 %v3486_v17 }
 0x7c4   : > { %v3488_v18 = vpop.xlane.xlu0 %3487 }
 0x7c5   : > { %v3489_v19 = vsub.f32 %v3482_v9, %v3488_v18 }
 0x7c7   : > { %v3490_v20 = vmul.f32 1.442695, %v3489_v19 }
 0x7c9   : > { %5786 = vpow2.f32 %v3490_v20 }
 0x7d3   : > { %v5787_v21 = vpop.eup %5786 }
 0x7d4   : > { %v3492_v22 = vsel %vm3485_vm8, %v5787_v21, 0.0 }
 0x7d5   : > { %3493 = vadd.xlane.f32.xlu0 %v3492_v22 }
 0x862   : > { %v3494_v23 = vpop.xlane.xlu0 %3493 }
 0x863   : > { %5788 = vlog2.f32 %v3494_v23 }
 0x86d   : > { %v5789_v24 = vpop.eup %5788 }
 0x86e   : > { %v3496_v25 = vmul.f32 0.6931472, %v5789_v24 }
 0x870   : > { %v3497_v44 = vsub.f32 %v3489_v19, %v3496_v25 }
 0x872   : > { %3498 = vst.msk [vmem:[%s432_s20] sm:$0x1] %vm3485_vm8, %v3497_v44 }
 0x873   : > { %5803 = shalt.err (!%p5800_p3)
}
 0x874   : > { %s5804_s1 = scalar_lea.hbm %s7276_s23, 16  ;;  %s5808_s20 = scalar_lea.hbm %s7332_s13, 32 }
 0x875   : > { %p5805_p4 = scmp.ne.s32.totalorder %s7276_s23, %s5804_s1  ;;  %p5809_p9 = scmp.lt.u32.totalorder %s7276_s23, %s7332_s13 }
 0x876   : > { %p5810_p10 = scmp.lt.u32.totalorder %s5808_s20, %s5804_s1  ;;  %p5812_p12 = scmp.lt.u32.totalorder %s5804_s1, %s7276_s23 }
 0x877   : > { %p5806_p7 = pnand %p5805_p4, %p5966_p5 }
 0x878   : > { %p5811_p11 = por %p5810_p10, %p5809_p9 }
 0x879   : > { %p5807_p8 = pneg %p5806_p7 }
 0x87a   : > { %p5813_p13 = por %p5812_p12, %p5811_p11 }
 0x87c   : > { %p5814_p0 = pnand %p5813_p13, %p5807_p8 }
 0x87e   : > { %5817 = shalt.err (!%p5814_p0)
}
 0x87f   : > { %5734 = dma.vmem_to_hbm [thread:$0]  (%p5966_p5), %s7278_s21, 16, %s7276_s23, %s3500_s24  }
 0x880 PF: > { %p5740_p1 = scmp.ge.s32.totalorder %s5852_s28, 2  ;;  %s3524_s30 = sand.u32 1, %s5840_s25  }
 0x881   : > { %s3525_s29 = scalar_lea.sflag [#allocation3], %s3524_s30 }
 0x882   : > { %p5737_p2 = pnand %p5740_p1, %p5970_p6 }
 0x884   : > { %5835 = dma.done.wait (!%p5737_p2), %s3525_s29, 16  }
 0x885   : > { %5837 = vsyncadd (!%p5737_p2), %s3525_s29, 4294967280  ;;  %s7342_s15 = sld [smem:[#allocation5_spill]]  ;;  %s7343_s27 = sld [smem:[#allocation6_spill]] }
 0x886   : > { %p23_p3 = scmp.ge.s32.totalorder %s5953_s14, 4   ;;  %s7344_s25 = smov %s5844_s26 }
 0x887   : > { %s7346_s28 = smov %s5953_s14 }
 0x888   :  { %25 = sbr.rel (!%p23_p3) target bundleno = 6 (0x6), region = 129 }
 0x88b   : > { %s7345_s26 = smov %s7342_s15 }
 0x88f   :  { %3529 = vsyncpa [#allocation3], 1 }
 0x890   :  { %3531 = vsyncpa [#allocation3 + $0x1], 1 }

</bundles_post_ra>
